<compile_context>
chip_gen: v7x
topology: tpu7x:2x2x1
jax: 0.10.0
libtpu: 0.0.40
codegen_flags: <defaults>
</compile_context>

<pallas_src>
import functools

import jax
import jax.numpy as jnp
from jax.experimental import pallas as pl
from jax.experimental.pallas import tpu as pltpu


def _attn_ff_kernel(x_ref, ga_ref, wqkv_ref, wg_ref, bg_ref, wo_ref,
                    cos_ref, sin_ref,
                    gf_ref, w1_ref, b1_ref, w2_ref, b2_ref,
                    o_ref, *, n_head, dim_head):
    """One roformer block (Attention + FeedForward, both with residuals).

    x_ref block is (BS, N, C): BS independent sequences of length N.
    Row-parallel matmuls run on the flattened (BS*N, C) view; only the NxN
    attention is done per sequence (batched einsum over BS).
    """
    BS, N, C = x_ref.shape
    M = BS * N
    D = dim_head
    bf16 = jnp.bfloat16
    rms_scale = float(C) ** 0.5

    def rmsnorm(v, g):
        # F.normalize(x, dim=-1) * sqrt(dim) * gamma     (rsqrt -> EUP slot)
        ss = jnp.sum(v * v, axis=-1, keepdims=True)
        return v * jax.lax.rsqrt(jnp.maximum(ss, 1e-24)) * rms_scale * g

    x2 = x_ref[...].astype(jnp.float32).reshape(M, C)          # (M, C)

    # ------------- Attention (pre-norm, folded RoPE, gated heads) -------------
    xn = rmsnorm(x2, ga_ref[...])
    xn_b = xn.astype(bf16)

    # Single fused projection: [q | k | v | q@rot | k@rot]  -> (M, 5C), f32 acc.
    qkvr = jnp.dot(xn_b, wqkv_ref[...], preferred_element_type=jnp.float32)
    # Lane-dense gates: w_gates was expanded to (C, C) in the wrapper.
    gates = jax.nn.sigmoid(
        jnp.dot(xn_b, wg_ref[...], preferred_element_type=jnp.float32)
        + bg_ref[...])                                          # (M, C)

    qkvr3 = qkvr.reshape(BS, N, 5 * C)
    cos = cos_ref[...]                                          # (N, C)
    sin = sin_ref[...]                                          # (N, C)
    # interleaved RoPE: t*cos + rotate_half(t)*sin (rotate_half pre-folded).
    q3 = qkvr3[..., 0:C] * cos + qkvr3[..., 3 * C:4 * C] * sin  # (BS, N, C)
    k3 = qkvr3[..., C:2 * C] * cos + qkvr3[..., 4 * C:5 * C] * sin
    v3 = qkvr3[..., 2 * C:3 * C]
    gates3 = gates.reshape(BS, N, C)

    wo = wo_ref[...]                                            # (C, C) bf16
    scale = float(D) ** -0.5
    attn = jnp.zeros((M, C), jnp.float32)
    for h in range(n_head):                                     # static unroll
        sl = slice(h * D, (h + 1) * D)
        qh = q3[..., sl].astype(bf16)
        kh = k3[..., sl].astype(bf16)
        vh = v3[..., sl].astype(bf16)
        s = jnp.einsum('bnd,bmd->bnm', qh, kh,
                       preferred_element_type=jnp.float32) * scale
        s = s - jnp.max(s, axis=-1, keepdims=True)
        p = jnp.exp(s)
        p = p * pl.reciprocal(jnp.sum(p, axis=-1, keepdims=True), approx=True)
        oh = jnp.einsum('bnm,bmd->bnd', p.astype(bf16), vh,
                        preferred_element_type=jnp.float32)     # (BS, N, D)
        oh = oh * gates3[..., sl]                               # gated head
        # accumulate through the per-head rows of W_out (no lane-narrow concat)
        attn = attn + jnp.dot(oh.reshape(M, D).astype(bf16), wo[sl, :],
                              preferred_element_type=jnp.float32)
    x2 = x2 + attn                                              # residual

    # ------------- FeedForward (RMSNorm -> Linear -> GELU -> Linear) ----------
    xn2 = rmsnorm(x2, gf_ref[...])
    hid = jnp.dot(xn2.astype(bf16), w1_ref[...],
                  preferred_element_type=jnp.float32) + b1_ref[...]
    hid = 0.5 * hid * (1.0 + jax.lax.erf(hid * 0.7071067811865476))  # exact GELU
    ff = jnp.dot(hid.astype(bf16), w2_ref[...],
                 preferred_element_type=jnp.float32) + b2_ref[...]
    x2 = x2 + ff                                                # residual

    o_ref[...] = x2.reshape(BS, N, C).astype(o_ref.dtype)


def _pick_seq_block(B, N, target_rows=512):
    """Largest divisor of B with ~target_rows flattened rows; keep grid >= 2."""
    want = max(1, min(B, target_rows // max(N, 1)))
    if want >= B and B >= 2:
        want = max(1, B // 2)          # leave >=2 grid steps for v7x's 2 TCs
    for cand in range(want, 0, -1):
        if B % cand == 0:
            return cand
    return 1


def attn_ff_block(x, p, n_head, dim_head, target_rows=512):
    """Apply one fused attention+FF block to x of shape (B, N, C)."""
    B, N, C = x.shape
    bs = _pick_seq_block(B, N, target_rows)
    kern = functools.partial(_attn_ff_kernel, n_head=n_head, dim_head=dim_head)

    params = [p["gamma_attn"], p["w_qkvr"], p["w_gates"], p["b_gates"],
              p["w_out"], p["cos"], p["sin"],
              p["gamma_ff"], p["w_ff1"], p["b_ff1"], p["w_ff2"], p["b_ff2"]]

    def full_spec(arr):
        nd = arr.ndim
        return pl.BlockSpec(arr.shape, lambda b, _nd=nd: (0,) * _nd)

    in_specs = ([pl.BlockSpec((bs, N, C), lambda b: (b, 0, 0))]
                + [full_spec(a) for a in params])

    return pl.pallas_call(
        kern,
        out_shape=jax.ShapeDtypeStruct((B, N, C), x.dtype),
        grid_spec=pltpu.PrefetchScalarGridSpec(
            num_scalar_prefetch=0,
            grid=(B // bs,),
            in_specs=in_specs,
            out_specs=pl.BlockSpec((bs, N, C), lambda b: (b, 0, 0)),
        ),
        compiler_params=pltpu.CompilerParams(
            dimension_semantics=("parallel",),
            vmem_limit_bytes=48 * 1024 * 1024,
        ),
    )(x, *params)


def init_block_params(key, C, n_head, n_seq):
    """Deterministic synthetic raw (f32) params for one Attention+FF block."""
    d = C // n_head
    ks = jax.random.split(key, 10)

    def w(k, shape, scale):
        return jax.random.normal(k, shape, jnp.float32) * scale

    p = {
        "gamma_attn": 1.0 + 0.02 * jax.random.normal(ks[0], (1, C), jnp.float32),
        "w_qkv": w(ks[1], (C, 3 * C), C ** -0.5),        # Linear(dim, 3*dim, bias=False)^T
        "w_gates": w(ks[2], (C, n_head), C ** -0.5),     # Linear(dim, heads)^T
        "b_gates": w(ks[3], (1, n_head), 0.1),
        "w_out": w(ks[4], (C, C), C ** -0.5),            # Linear(dim_inner, dim, bias=False)^T
        "gamma_ff": 1.0 + 0.02 * jax.random.normal(ks[5], (1, C), jnp.float32),
        "w_ff1": w(ks[6], (C, 4 * C), C ** -0.5),        # Linear(dim, 4*dim)^T
        "b_ff1": w(ks[7], (1, 4 * C), 0.1),
        "w_ff2": w(ks[8], (4 * C, C), (4 * C) ** -0.5),  # Linear(4*dim, dim)^T
        "b_ff2": w(ks[9], (1, C), 0.1),
    }

    # Rotary tables (rotary-embedding-torch default: theta=10000, interleaved
    # pairs, dim = dim_head, positions 0..n-1), tiled across heads.
    inv_freq = 1.0 / (10000.0 ** (jnp.arange(0, d, 2, dtype=jnp.float32) / d))
    pos = jnp.arange(n_seq, dtype=jnp.float32)
    fr = pos[:, None] * inv_freq[None, :]                 # (N, d/2)
    fr = jnp.repeat(fr, 2, axis=-1)                       # (N, d) interleaved
    fr = jnp.tile(fr, (1, n_head))                        # (N, C)
    p["cos"] = jnp.cos(fr)
    p["sin"] = jnp.sin(fr)

    # rotate_half as a signed pair-swap matrix (only used for folding + reference):
    # (x @ rot)[2i] = -x[2i+1],  (x @ rot)[2i+1] = x[2i]
    idx = jnp.arange(C)
    rot = jnp.zeros((C, C), jnp.float32)
    rot = rot.at[idx[1::2], idx[0::2]].set(-1.0)
    rot = rot.at[idx[0::2], idx[1::2]].set(1.0)
    p["rot"] = rot
    return p


def prepare_block_params(p, n_head, dim_head):
    """Fold rotate_half into the QKV projection, expand gates to full channel
    width, and cast all matmul weights to bf16 for the MXU."""
    C = p["w_out"].shape[0]
    bf16 = jnp.bfloat16
    wq = p["w_qkv"][:, :C]
    wk = p["w_qkv"][:, C:2 * C]
    wv = p["w_qkv"][:, 2 * C:]
    rot = p["rot"]
    w_qkvr = jnp.concatenate([wq, wk, wv, wq @ rot, wk @ rot], axis=1)  # (C, 5C)

    # per-head gate column replicated dim_head times -> lane-dense (C, C)
    rep = jnp.repeat(jnp.eye(n_head, dtype=jnp.float32), dim_head, axis=1)  # (H, C)
    w_gates_full = p["w_gates"] @ rep                    # (C, C)
    b_gates_full = p["b_gates"] @ rep                    # (1, C)

    return {
        "gamma_attn": p["gamma_attn"],
        "w_qkvr": w_qkvr.astype(bf16),
        "w_gates": w_gates_full.astype(bf16),
        "b_gates": b_gates_full,
        "w_out": p["w_out"].astype(bf16),
        "cos": p["cos"],
        "sin": p["sin"],
        "gamma_ff": p["gamma_ff"],
        "w_ff1": p["w_ff1"].astype(bf16),
        "b_ff1": p["b_ff1"],
        "w_ff2": p["w_ff2"].astype(bf16),
        "b_ff2": p["b_ff2"],
    }


def partial_ft_transformer(x, params_f, params_t, n_head, dim_head):
    """x: (b, c, f, t) -> (b, c, f, t), matching PartialFTTransformer.forward."""
    b, c, f, t = x.shape
    # 'b c f t -> (b t) f c'
    y = jnp.transpose(x, (0, 3, 2, 1)).reshape(b * t, f, c)
    y = attn_ff_block(y, params_f, n_head, dim_head)      # x + attnF(x); x + ffF(x)
    # '(b t) f c -> (b f) t c'
    y = y.reshape(b, t, f, c).transpose(0, 2, 1, 3).reshape(b * f, t, c)
    y = attn_ff_block(y, params_t, n_head, dim_head)      # x + attnT(x); x + ffT(x)
    # '(b f) t c -> b c f t'
    return y.reshape(b, f, t, c).transpose(0, 3, 1, 2)


# ----------------------------- pure-JAX reference -----------------------------
def _block_ref(x, p, n_head, dim_head):
    """Original (unfused, f32) roformer block math, for validation."""
    B, N, C = x.shape
    rms_scale = C ** 0.5

    def rmsnorm(v, g):
        nrm = jnp.sqrt(jnp.sum(v * v, axis=-1, keepdims=True))
        return v / jnp.maximum(nrm, 1e-12) * rms_scale * g

    xn = rmsnorm(x, p["gamma_attn"])
    qkv = xn @ p["w_qkv"]
    q, k, v = qkv[..., :C], qkv[..., C:2 * C], qkv[..., 2 * C:]

    def rope(tq):
        return tq * p["cos"] + (tq @ p["rot"]) * p["sin"]

    q, k = rope(q), rope(k)
    qh = q.reshape(B, N, n_head, dim_head).transpose(0, 2, 1, 3)
    kh = k.reshape(B, N, n_head, dim_head).transpose(0, 2, 1, 3)
    vh = v.reshape(B, N, n_head, dim_head).transpose(0, 2, 1, 3)
    s = jnp.einsum('bhnd,bhmd->bhnm', qh, kh) * dim_head ** -0.5
    pr = jax.nn.softmax(s, axis=-1)
    o = jnp.einsum('bhnm,bhmd->bhnd', pr, vh)
    gates = jax.nn.sigmoid(xn @ p["w_gates"] + p["b_gates"])
    o = o * gates.transpose(0, 2, 1)[..., None]
    o = o.transpose(0, 2, 1, 3).reshape(B, N, C)
    x = x + o @ p["w_out"]

    xn2 = rmsnorm(x, p["gamma_ff"])
    hid = xn2 @ p["w_ff1"] + p["b_ff1"]
    hid = 0.5 * hid * (1.0 + jax.lax.erf(hid * 0.7071067811865476))
    return x + hid @ p["w_ff2"] + p["b_ff2"]


if __name__ == "__main__":
    b, dim, f, t = 2, 32, 8, 8
    n_head, dim_head = 2, 16            # dim // dim_head == n_head

    key = jax.random.PRNGKey(0)
    kx, kF, kT = jax.random.split(key, 3)
    x = jax.random.normal(kx, (b, dim, f, t), jnp.float32)
    raw_f = init_block_params(kF, dim, n_head, n_seq=f)
    raw_t = init_block_params(kT, dim, n_head, n_seq=t)
    params_f = prepare_block_params(raw_f, n_head, dim_head)
    params_t = prepare_block_params(raw_t, n_head, dim_head)

    out = partial_ft_transformer(x, params_f, params_t, n_head, dim_head)
    out = jax.block_until_ready(out)
    assert out.shape == x.shape and out.dtype == x.dtype

    # pure-JAX f32 reference (original math, no Pallas, no bf16) as sanity check
    y = jnp.transpose(x, (0, 3, 2, 1)).reshape(b * t, f, dim)
    y = _block_ref(y, raw_f, n_head, dim_head)
    y = y.reshape(b, t, f, dim).transpose(0, 2, 1, 3).reshape(b * f, t, dim)
    y = _block_ref(y, raw_t, n_head, dim_head)
    ref = y.reshape(b, f, t, dim).transpose(0, 3, 1, 2)

    assert bool(jnp.all(jnp.isfinite(out))), "non-finite values in kernel output"
    max_err = float(jnp.max(jnp.abs(out - ref)))
    rel_err = float(jnp.linalg.norm(out - ref) / jnp.linalg.norm(ref))
    # bf16 MXU inputs loosen bitwise tolerance; real bugs would give O(1) errors.
    assert rel_err < 5e-2 and max_err < 0.5, \
        f"mismatch vs f32 reference: rel={rel_err}, max_abs={max_err}"

    print("KERNEL_OK")
</pallas_src>

<mosaic_0001>
module attributes {stable_mosaic.version = 11 : i64} {
  func.func @_attn_ff_kernel(%arg0: i32, %arg1: memref<8x8x32xf32, #tpu.memory_space<vmem>>, %arg2: memref<1x32xf32, #tpu.memory_space<vmem>>, %arg3: memref<32x160xbf16, #tpu.memory_space<vmem>>, %arg4: memref<32x32xbf16, #tpu.memory_space<vmem>>, %arg5: memref<1x32xf32, #tpu.memory_space<vmem>>, %arg6: memref<32x32xbf16, #tpu.memory_space<vmem>>, %arg7: memref<8x32xf32, #tpu.memory_space<vmem>>, %arg8: memref<8x32xf32, #tpu.memory_space<vmem>>, %arg9: memref<1x32xf32, #tpu.memory_space<vmem>>, %arg10: memref<32x128xbf16, #tpu.memory_space<vmem>>, %arg11: memref<1x128xf32, #tpu.memory_space<vmem>>, %arg12: memref<128x32xbf16, #tpu.memory_space<vmem>>, %arg13: memref<1x32xf32, #tpu.memory_space<vmem>>, %arg14: memref<8x8x32xf32, #tpu.memory_space<vmem>>) attributes {dimension_semantics = [#tpu.dimension_semantics<parallel>], iteration_bounds = array<i64: 2>, scalar_prefetch = 0 : i64, scratch_operands = 0 : i64, tpu.core_type = #tpu.core_type<tc>, window_params = [{transform_indices = @transform_0, window_bounds = array<i64: 8, 8, 32>}, {pipeline_mode = #tpu.pipeline_mode<synchronous>, transform_indices = @transform_1, window_bounds = array<i64: 1, 32>}, {pipeline_mode = #tpu.pipeline_mode<synchronous>, transform_indices = @transform_2, window_bounds = array<i64: 32, 160>}, {pipeline_mode = #tpu.pipeline_mode<synchronous>, transform_indices = @transform_3, window_bounds = array<i64: 32, 32>}, {pipeline_mode = #tpu.pipeline_mode<synchronous>, transform_indices = @transform_4, window_bounds = array<i64: 1, 32>}, {pipeline_mode = #tpu.pipeline_mode<synchronous>, transform_indices = @transform_5, window_bounds = array<i64: 32, 32>}, {pipeline_mode = #tpu.pipeline_mode<synchronous>, transform_indices = @transform_6, window_bounds = array<i64: 8, 32>}, {pipeline_mode = #tpu.pipeline_mode<synchronous>, transform_indices = @transform_7, window_bounds = array<i64: 8, 32>}, {pipeline_mode = #tpu.pipeline_mode<synchronous>, transform_indices = @transform_8, window_bounds = array<i64: 1, 32>}, {pipeline_mode = #tpu.pipeline_mode<synchronous>, transform_indices = @transform_9, window_bounds = array<i64: 32, 128>}, {pipeline_mode = #tpu.pipeline_mode<synchronous>, transform_indices = @transform_10, window_bounds = array<i64: 1, 128>}, {pipeline_mode = #tpu.pipeline_mode<synchronous>, transform_indices = @transform_11, window_bounds = array<i64: 128, 32>}, {pipeline_mode = #tpu.pipeline_mode<synchronous>, transform_indices = @transform_12, window_bounds = array<i64: 1, 32>}, {transform_indices = @transform_13, window_bounds = array<i64: 8, 8, 32>}]} {
    %c0 = arith.constant 0 : index
    %c0_0 = arith.constant 0 : index
    %c0_1 = arith.constant 0 : index
    %0 = vector.load %arg1[%c0, %c0_0, %c0_1] : memref<8x8x32xf32, #tpu.memory_space<vmem>>, vector<8x8x32xf32>
    %1 = vector.shape_cast %0 : vector<8x8x32xf32> to vector<64x32xf32>
    %c0_2 = arith.constant 0 : index
    %c0_3 = arith.constant 0 : index
    %2 = vector.load %arg2[%c0_2, %c0_3] : memref<1x32xf32, #tpu.memory_space<vmem>>, vector<1x32xf32>
    %3 = arith.mulf %1, %1 : vector<64x32xf32>
    %cst = arith.constant dense<0.000000e+00> : vector<64xf32>
    %4 = vector.multi_reduction <add>, %3, %cst [1] : vector<64x32xf32> to vector<64xf32>
    %5 = vector.shape_cast %4 : vector<64xf32> to vector<64x1xf32>
    %cst_4 = arith.constant 1.000000e-24 : f32
    %6 = vector.broadcast %cst_4 : f32 to vector<64x1xf32>
    %7 = arith.maximumf %5, %6 : vector<64x1xf32>
    %8 = math.rsqrt %7 : vector<64x1xf32>
    %9 = vector.broadcast %8 : vector<64x1xf32> to vector<64x32xf32>
    %10 = arith.mulf %1, %9 : vector<64x32xf32>
    %cst_5 = arith.constant 5.65685415 : f32
    %11 = vector.broadcast %cst_5 : f32 to vector<64x32xf32>
    %12 = arith.mulf %10, %11 : vector<64x32xf32>
    %13 = vector.broadcast %2 : vector<1x32xf32> to vector<64x32xf32>
    %14 = arith.mulf %12, %13 : vector<64x32xf32>
    %15 = arith.truncf %14 : vector<64x32xf32> to vector<64x32xbf16>
    %c0_6 = arith.constant 0 : index
    %c0_7 = arith.constant 0 : index
    %16 = vector.load %arg3[%c0_6, %c0_7] : memref<32x160xbf16, #tpu.memory_space<vmem>>, vector<32x160xbf16>
    %cst_8 = arith.constant dense<0.000000e+00> : vector<64x160xf32>
    %17 = tpu.matmul %15, %16, %cst_8 {dimension_numbers = #tpu.dot_dimension_numbers<[1], [0], [0], [1], [0, 0, 1, 1], [], []>} : vector<64x32xbf16>, vector<32x160xbf16>, vector<64x160xf32> -> vector<64x160xf32>
    %c0_9 = arith.constant 0 : index
    %c0_10 = arith.constant 0 : index
    %18 = vector.load %arg4[%c0_9, %c0_10] : memref<32x32xbf16, #tpu.memory_space<vmem>>, vector<32x32xbf16>
    %cst_11 = arith.constant dense<0.000000e+00> : vector<64x32xf32>
    %19 = tpu.matmul %15, %18, %cst_11 {dimension_numbers = #tpu.dot_dimension_numbers<[1], [0], [0], [1], [0, 0, 1, 1], [], []>} : vector<64x32xbf16>, vector<32x32xbf16>, vector<64x32xf32> -> vector<64x32xf32>
    %c0_12 = arith.constant 0 : index
    %c0_13 = arith.constant 0 : index
    %20 = vector.load %arg5[%c0_12, %c0_13] : memref<1x32xf32, #tpu.memory_space<vmem>>, vector<1x32xf32>
    %21 = vector.broadcast %20 : vector<1x32xf32> to vector<64x32xf32>
    %22 = arith.addf %19, %21 : vector<64x32xf32>
    %23 = arith.negf %22 : vector<64x32xf32>
    %24 = math.exp %23 : vector<64x32xf32>
    %cst_14 = arith.constant 1.000000e+00 : f32
    %25 = vector.broadcast %cst_14 : f32 to vector<64x32xf32>
    %26 = arith.addf %25, %24 : vector<64x32xf32>
    %27 = arith.divf %25, %26 : vector<64x32xf32>
    %28 = vector.shape_cast %17 : vector<64x160xf32> to vector<8x8x160xf32>
    %c0_15 = arith.constant 0 : index
    %c0_16 = arith.constant 0 : index
    %29 = vector.load %arg7[%c0_15, %c0_16] : memref<8x32xf32, #tpu.memory_space<vmem>>, vector<8x32xf32>
    %c0_17 = arith.constant 0 : index
    %c0_18 = arith.constant 0 : index
    %30 = vector.load %arg8[%c0_17, %c0_18] : memref<8x32xf32, #tpu.memory_space<vmem>>, vector<8x32xf32>
    %31 = vector.extract_strided_slice %28 {offsets = [0, 0, 0], sizes = [8, 8, 32], strides = [1, 1, 1]} : vector<8x8x160xf32> to vector<8x8x32xf32>
    %32 = vector.shape_cast %29 : vector<8x32xf32> to vector<1x8x32xf32>
    %33 = vector.broadcast %32 : vector<1x8x32xf32> to vector<8x8x32xf32>
    %34 = arith.mulf %31, %33 : vector<8x8x32xf32>
    %35 = vector.extract_strided_slice %28 {offsets = [0, 0, 96], sizes = [8, 8, 32], strides = [1, 1, 1]} : vector<8x8x160xf32> to vector<8x8x32xf32>
    %36 = vector.shape_cast %30 : vector<8x32xf32> to vector<1x8x32xf32>
    %37 = vector.broadcast %36 : vector<1x8x32xf32> to vector<8x8x32xf32>
    %38 = arith.mulf %35, %37 : vector<8x8x32xf32>
    %39 = arith.addf %34, %38 : vector<8x8x32xf32>
    %40 = vector.extract_strided_slice %28 {offsets = [0, 0, 32], sizes = [8, 8, 32], strides = [1, 1, 1]} : vector<8x8x160xf32> to vector<8x8x32xf32>
    %41 = vector.shape_cast %29 : vector<8x32xf32> to vector<1x8x32xf32>
    %42 = vector.broadcast %41 : vector<1x8x32xf32> to vector<8x8x32xf32>
    %43 = arith.mulf %40, %42 : vector<8x8x32xf32>
    %44 = vector.extract_strided_slice %28 {offsets = [0, 0, 128], sizes = [8, 8, 32], strides = [1, 1, 1]} : vector<8x8x160xf32> to vector<8x8x32xf32>
    %45 = vector.shape_cast %30 : vector<8x32xf32> to vector<1x8x32xf32>
    %46 = vector.broadcast %45 : vector<1x8x32xf32> to vector<8x8x32xf32>
    %47 = arith.mulf %44, %46 : vector<8x8x32xf32>
    %48 = arith.addf %43, %47 : vector<8x8x32xf32>
    %49 = vector.extract_strided_slice %28 {offsets = [0, 0, 64], sizes = [8, 8, 32], strides = [1, 1, 1]} : vector<8x8x160xf32> to vector<8x8x32xf32>
    %50 = vector.shape_cast %27 : vector<64x32xf32> to vector<8x8x32xf32>
    %c0_19 = arith.constant 0 : index
    %c0_20 = arith.constant 0 : index
    %51 = vector.load %arg6[%c0_19, %c0_20] : memref<32x32xbf16, #tpu.memory_space<vmem>>, vector<32x32xbf16>
    %cst_21 = arith.constant 0.000000e+00 : f32
    %52 = vector.broadcast %cst_21 : f32 to vector<64x32xf32>
    %53 = vector.extract_strided_slice %39 {offsets = [0, 0, 0], sizes = [8, 8, 16], strides = [1, 1, 1]} : vector<8x8x32xf32> to vector<8x8x16xf32>
    %54 = arith.truncf %53 : vector<8x8x16xf32> to vector<8x8x16xbf16>
    %55 = vector.extract_strided_slice %48 {offsets = [0, 0, 0], sizes = [8, 8, 16], strides = [1, 1, 1]} : vector<8x8x32xf32> to vector<8x8x16xf32>
    %56 = arith.truncf %55 : vector<8x8x16xf32> to vector<8x8x16xbf16>
    %57 = vector.extract_strided_slice %49 {offsets = [0, 0, 0], sizes = [8, 8, 16], strides = [1, 1, 1]} : vector<8x8x32xf32> to vector<8x8x16xf32>
    %58 = arith.truncf %57 : vector<8x8x16xf32> to vector<8x8x16xbf16>
    "tpu.trace_start"() <{level = 10 : i32, message = "bnd,bmd->bnm"}> : () -> ()
    %cst_22 = arith.constant dense<0.000000e+00> : vector<8x8x8xf32>
    %59 = tpu.matmul %54, %56, %cst_22 {dimension_numbers = #tpu.dot_dimension_numbers<[2], [2], [1], [1], [0, 0, 0, 1, 1, 1], [0], [0]>} : vector<8x8x16xbf16>, vector<8x8x16xbf16>, vector<8x8x8xf32> -> vector<8x8x8xf32>
    "tpu.trace_stop"() : () -> ()
    %cst_23 = arith.constant 2.500000e-01 : f32
    %60 = vector.broadcast %cst_23 : f32 to vector<8x8x8xf32>
    %61 = arith.mulf %59, %60 : vector<8x8x8xf32>
    %cst_24 = arith.constant dense<0xFF800000> : vector<8x8xf32>
    %62 = vector.multi_reduction <maximumf>, %61, %cst_24 [2] : vector<8x8x8xf32> to vector<8x8xf32>
    %63 = vector.shape_cast %62 : vector<8x8xf32> to vector<8x8x1xf32>
    %64 = vector.broadcast %63 : vector<8x8x1xf32> to vector<8x8x8xf32>
    %65 = arith.subf %61, %64 : vector<8x8x8xf32>
    %66 = math.exp %65 : vector<8x8x8xf32>
    %cst_25 = arith.constant dense<0.000000e+00> : vector<8x8xf32>
    %67 = vector.multi_reduction <add>, %66, %cst_25 [2] : vector<8x8x8xf32> to vector<8x8xf32>
    %68 = vector.shape_cast %67 : vector<8x8xf32> to vector<8x8x1xf32>
    %69 = tpu.reciprocal %68 {approx = true} : vector<8x8x1xf32> -> vector<8x8x1xf32>
    %70 = vector.broadcast %69 : vector<8x8x1xf32> to vector<8x8x8xf32>
    %71 = arith.mulf %66, %70 : vector<8x8x8xf32>
    %72 = arith.truncf %71 : vector<8x8x8xf32> to vector<8x8x8xbf16>
    "tpu.trace_start"() <{level = 10 : i32, message = "bnm,bmd->bnd"}> : () -> ()
    %cst_26 = arith.constant dense<0.000000e+00> : vector<8x8x16xf32>
    %73 = tpu.matmul %72, %58, %cst_26 {dimension_numbers = #tpu.dot_dimension_numbers<[2], [1], [1], [2], [0, 0, 0, 1, 1, 2], [0], [0]>} : vector<8x8x8xbf16>, vector<8x8x16xbf16>, vector<8x8x16xf32> -> vector<8x8x16xf32>
    "tpu.trace_stop"() : () -> ()
    %74 = vector.extract_strided_slice %50 {offsets = [0, 0, 0], sizes = [8, 8, 16], strides = [1, 1, 1]} : vector<8x8x32xf32> to vector<8x8x16xf32>
    %75 = arith.mulf %73, %74 : vector<8x8x16xf32>
    %76 = vector.shape_cast %75 : vector<8x8x16xf32> to vector<64x16xf32>
    %77 = arith.truncf %76 : vector<64x16xf32> to vector<64x16xbf16>
    %78 = vector.extract_strided_slice %51 {offsets = [0, 0], sizes = [16, 32], strides = [1, 1]} : vector<32x32xbf16> to vector<16x32xbf16>
    %cst_27 = arith.constant dense<0.000000e+00> : vector<64x32xf32>
    %79 = tpu.matmul %77, %78, %cst_27 {dimension_numbers = #tpu.dot_dimension_numbers<[1], [0], [0], [1], [0, 0, 1, 1], [], []>} : vector<64x16xbf16>, vector<16x32xbf16>, vector<64x32xf32> -> vector<64x32xf32>
    %80 = arith.addf %52, %79 : vector<64x32xf32>
    %81 = vector.extract_strided_slice %39 {offsets = [0, 0, 16], sizes = [8, 8, 16], strides = [1, 1, 1]} : vector<8x8x32xf32> to vector<8x8x16xf32>
    %82 = arith.truncf %81 : vector<8x8x16xf32> to vector<8x8x16xbf16>
    %83 = vector.extract_strided_slice %48 {offsets = [0, 0, 16], sizes = [8, 8, 16], strides = [1, 1, 1]} : vector<8x8x32xf32> to vector<8x8x16xf32>
    %84 = arith.truncf %83 : vector<8x8x16xf32> to vector<8x8x16xbf16>
    %85 = vector.extract_strided_slice %49 {offsets = [0, 0, 16], sizes = [8, 8, 16], strides = [1, 1, 1]} : vector<8x8x32xf32> to vector<8x8x16xf32>
    %86 = arith.truncf %85 : vector<8x8x16xf32> to vector<8x8x16xbf16>
    "tpu.trace_start"() <{level = 10 : i32, message = "bnd,bmd->bnm"}> : () -> ()
    %cst_28 = arith.constant dense<0.000000e+00> : vector<8x8x8xf32>
    %87 = tpu.matmul %82, %84, %cst_28 {dimension_numbers = #tpu.dot_dimension_numbers<[2], [2], [1], [1], [0, 0, 0, 1, 1, 1], [0], [0]>} : vector<8x8x16xbf16>, vector<8x8x16xbf16>, vector<8x8x8xf32> -> vector<8x8x8xf32>
    "tpu.trace_stop"() : () -> ()
    %cst_29 = arith.constant 2.500000e-01 : f32
    %88 = vector.broadcast %cst_29 : f32 to vector<8x8x8xf32>
    %89 = arith.mulf %87, %88 : vector<8x8x8xf32>
    %cst_30 = arith.constant dense<0xFF800000> : vector<8x8xf32>
    %90 = vector.multi_reduction <maximumf>, %89, %cst_30 [2] : vector<8x8x8xf32> to vector<8x8xf32>
    %91 = vector.shape_cast %90 : vector<8x8xf32> to vector<8x8x1xf32>
    %92 = vector.broadcast %91 : vector<8x8x1xf32> to vector<8x8x8xf32>
    %93 = arith.subf %89, %92 : vector<8x8x8xf32>
    %94 = math.exp %93 : vector<8x8x8xf32>
    %cst_31 = arith.constant dense<0.000000e+00> : vector<8x8xf32>
    %95 = vector.multi_reduction <add>, %94, %cst_31 [2] : vector<8x8x8xf32> to vector<8x8xf32>
    %96 = vector.shape_cast %95 : vector<8x8xf32> to vector<8x8x1xf32>
    %97 = tpu.reciprocal %96 {approx = true} : vector<8x8x1xf32> -> vector<8x8x1xf32>
    %98 = vector.broadcast %97 : vector<8x8x1xf32> to vector<8x8x8xf32>
    %99 = arith.mulf %94, %98 : vector<8x8x8xf32>
    %100 = arith.truncf %99 : vector<8x8x8xf32> to vector<8x8x8xbf16>
    "tpu.trace_start"() <{level = 10 : i32, message = "bnm,bmd->bnd"}> : () -> ()
    %cst_32 = arith.constant dense<0.000000e+00> : vector<8x8x16xf32>
    %101 = tpu.matmul %100, %86, %cst_32 {dimension_numbers = #tpu.dot_dimension_numbers<[2], [1], [1], [2], [0, 0, 0, 1, 1, 2], [0], [0]>} : vector<8x8x8xbf16>, vector<8x8x16xbf16>, vector<8x8x16xf32> -> vector<8x8x16xf32>
    "tpu.trace_stop"() : () -> ()
    %102 = vector.extract_strided_slice %50 {offsets = [0, 0, 16], sizes = [8, 8, 16], strides = [1, 1, 1]} : vector<8x8x32xf32> to vector<8x8x16xf32>
    %103 = arith.mulf %101, %102 : vector<8x8x16xf32>
    %104 = vector.shape_cast %103 : vector<8x8x16xf32> to vector<64x16xf32>
    %105 = arith.truncf %104 : vector<64x16xf32> to vector<64x16xbf16>
    %106 = vector.extract_strided_slice %51 {offsets = [16, 0], sizes = [16, 32], strides = [1, 1]} : vector<32x32xbf16> to vector<16x32xbf16>
    %cst_33 = arith.constant dense<0.000000e+00> : vector<64x32xf32>
    %107 = tpu.matmul %105, %106, %cst_33 {dimension_numbers = #tpu.dot_dimension_numbers<[1], [0], [0], [1], [0, 0, 1, 1], [], []>} : vector<64x16xbf16>, vector<16x32xbf16>, vector<64x32xf32> -> vector<64x32xf32>
    %108 = arith.addf %80, %107 : vector<64x32xf32>
    %109 = arith.addf %1, %108 : vector<64x32xf32>
    %c0_34 = arith.constant 0 : index
    %c0_35 = arith.constant 0 : index
    %110 = vector.load %arg9[%c0_34, %c0_35] : memref<1x32xf32, #tpu.memory_space<vmem>>, vector<1x32xf32>
    %111 = arith.mulf %109, %109 : vector<64x32xf32>
    %cst_36 = arith.constant dense<0.000000e+00> : vector<64xf32>
    %112 = vector.multi_reduction <add>, %111, %cst_36 [1] : vector<64x32xf32> to vector<64xf32>
    %113 = vector.shape_cast %112 : vector<64xf32> to vector<64x1xf32>
    %cst_37 = arith.constant 1.000000e-24 : f32
    %114 = vector.broadcast %cst_37 : f32 to vector<64x1xf32>
    %115 = arith.maximumf %113, %114 : vector<64x1xf32>
    %116 = math.rsqrt %115 : vector<64x1xf32>
    %117 = vector.broadcast %116 : vector<64x1xf32> to vector<64x32xf32>
    %118 = arith.mulf %109, %117 : vector<64x32xf32>
    %cst_38 = arith.constant 5.65685415 : f32
    %119 = vector.broadcast %cst_38 : f32 to vector<64x32xf32>
    %120 = arith.mulf %118, %119 : vector<64x32xf32>
    %121 = vector.broadcast %110 : vector<1x32xf32> to vector<64x32xf32>
    %122 = arith.mulf %120, %121 : vector<64x32xf32>
    %123 = arith.truncf %122 : vector<64x32xf32> to vector<64x32xbf16>
    %c0_39 = arith.constant 0 : index
    %c0_40 = arith.constant 0 : index
    %124 = vector.load %arg10[%c0_39, %c0_40] : memref<32x128xbf16, #tpu.memory_space<vmem>>, vector<32x128xbf16>
    %cst_41 = arith.constant dense<0.000000e+00> : vector<64x128xf32>
    %125 = tpu.matmul %123, %124, %cst_41 {dimension_numbers = #tpu.dot_dimension_numbers<[1], [0], [0], [1], [0, 0, 1, 1], [], []>} : vector<64x32xbf16>, vector<32x128xbf16>, vector<64x128xf32> -> vector<64x128xf32>
    %c0_42 = arith.constant 0 : index
    %c0_43 = arith.constant 0 : index
    %126 = vector.load %arg11[%c0_42, %c0_43] : memref<1x128xf32, #tpu.memory_space<vmem>>, vector<1x128xf32>
    %127 = vector.broadcast %126 : vector<1x128xf32> to vector<64x128xf32>
    %128 = arith.addf %125, %127 : vector<64x128xf32>
    %cst_44 = arith.constant 5.000000e-01 : f32
    %129 = vector.broadcast %cst_44 : f32 to vector<64x128xf32>
    %130 = arith.mulf %129, %128 : vector<64x128xf32>
    %cst_45 = arith.constant 0.707106769 : f32
    %131 = vector.broadcast %cst_45 : f32 to vector<64x128xf32>
    %132 = arith.mulf %128, %131 : vector<64x128xf32>
    %133 = math.erf %132 : vector<64x128xf32>
    %cst_46 = arith.constant 1.000000e+00 : f32
    %134 = vector.broadcast %cst_46 : f32 to vector<64x128xf32>
    %135 = arith.addf %134, %133 : vector<64x128xf32>
    %136 = arith.mulf %130, %135 : vector<64x128xf32>
    %137 = arith.truncf %136 : vector<64x128xf32> to vector<64x128xbf16>
    %c0_47 = arith.constant 0 : index
    %c0_48 = arith.constant 0 : index
    %138 = vector.load %arg12[%c0_47, %c0_48] : memref<128x32xbf16, #tpu.memory_space<vmem>>, vector<128x32xbf16>
    %cst_49 = arith.constant dense<0.000000e+00> : vector<64x32xf32>
    %139 = tpu.matmul %137, %138, %cst_49 {dimension_numbers = #tpu.dot_dimension_numbers<[1], [0], [0], [1], [0, 0, 1, 1], [], []>} : vector<64x128xbf16>, vector<128x32xbf16>, vector<64x32xf32> -> vector<64x32xf32>
    %c0_50 = arith.constant 0 : index
    %c0_51 = arith.constant 0 : index
    %140 = vector.load %arg13[%c0_50, %c0_51] : memref<1x32xf32, #tpu.memory_space<vmem>>, vector<1x32xf32>
    %141 = vector.broadcast %140 : vector<1x32xf32> to vector<64x32xf32>
    %142 = arith.addf %139, %141 : vector<64x32xf32>
    %143 = arith.addf %109, %142 : vector<64x32xf32>
    %144 = vector.shape_cast %143 : vector<64x32xf32> to vector<8x8x32xf32>
    %c0_52 = arith.constant 0 : index
    %c0_53 = arith.constant 0 : index
    %c0_54 = arith.constant 0 : index
    %145 = vector.load %arg14[%c0_52, %c0_53, %c0_54] : memref<8x8x32xf32, #tpu.memory_space<vmem>>, vector<8x8x32xf32>
    tpu.vector_store %arg14[%c0_52, %c0_53, %c0_54], %144 {strides = array<i32>} : memref<8x8x32xf32, #tpu.memory_space<vmem>>, vector<8x8x32xf32>,
    return
  }
  func.func @transform_0(%arg0: i32) -> (i32, i32, i32) {
    %c0_i32 = arith.constant 0 : i32
    %c0_i32_0 = arith.constant 0 : i32
    %c0_i32_1 = arith.constant 0 : i32
    return %arg0, %c0_i32, %c0_i32_0 : i32, i32, i32
  }
  func.func @transform_1(%arg0: i32) -> (i32, i32) {
    %c0_i32 = arith.constant 0 : i32
    %c0_i32_0 = arith.constant 0 : i32
    %c0_i32_1 = arith.constant 0 : i32
    return %c0_i32, %c0_i32_0 : i32, i32
  }
  func.func @transform_2(%arg0: i32) -> (i32, i32) {
    %c0_i32 = arith.constant 0 : i32
    %c0_i32_0 = arith.constant 0 : i32
    %c0_i32_1 = arith.constant 0 : i32
    return %c0_i32, %c0_i32_0 : i32, i32
  }
  func.func @transform_3(%arg0: i32) -> (i32, i32) {
    %c0_i32 = arith.constant 0 : i32
    %c0_i32_0 = arith.constant 0 : i32
    %c0_i32_1 = arith.constant 0 : i32
    return %c0_i32, %c0_i32_0 : i32, i32
  }
  func.func @transform_4(%arg0: i32) -> (i32, i32) {
    %c0_i32 = arith.constant 0 : i32
    %c0_i32_0 = arith.constant 0 : i32
    %c0_i32_1 = arith.constant 0 : i32
    return %c0_i32, %c0_i32_0 : i32, i32
  }
  func.func @transform_5(%arg0: i32) -> (i32, i32) {
    %c0_i32 = arith.constant 0 : i32
    %c0_i32_0 = arith.constant 0 : i32
    %c0_i32_1 = arith.constant 0 : i32
    return %c0_i32, %c0_i32_0 : i32, i32
  }
  func.func @transform_6(%arg0: i32) -> (i32, i32) {
    %c0_i32 = arith.constant 0 : i32
    %c0_i32_0 = arith.constant 0 : i32
    %c0_i32_1 = arith.constant 0 : i32
    return %c0_i32, %c0_i32_0 : i32, i32
  }
  func.func @transform_7(%arg0: i32) -> (i32, i32) {
    %c0_i32 = arith.constant 0 : i32
    %c0_i32_0 = arith.constant 0 : i32
    %c0_i32_1 = arith.constant 0 : i32
    return %c0_i32, %c0_i32_0 : i32, i32
  }
  func.func @transform_8(%arg0: i32) -> (i32, i32) {
    %c0_i32 = arith.constant 0 : i32
    %c0_i32_0 = arith.constant 0 : i32
    %c0_i32_1 = arith.constant 0 : i32
    return %c0_i32, %c0_i32_0 : i32, i32
  }
  func.func @transform_9(%arg0: i32) -> (i32, i32) {
    %c0_i32 = arith.constant 0 : i32
    %c0_i32_0 = arith.constant 0 : i32
    %c0_i32_1 = arith.constant 0 : i32
    return %c0_i32, %c0_i32_0 : i32, i32
  }
  func.func @transform_10(%arg0: i32) -> (i32, i32) {
    %c0_i32 = arith.constant 0 : i32
    %c0_i32_0 = arith.constant 0 : i32
    %c0_i32_1 = arith.constant 0 : i32
    return %c0_i32, %c0_i32_0 : i32, i32
  }
  func.func @transform_11(%arg0: i32) -> (i32, i32) {
    %c0_i32 = arith.constant 0 : i32
    %c0_i32_0 = arith.constant 0 : i32
    %c0_i32_1 = arith.constant 0 : i32
    return %c0_i32, %c0_i32_0 : i32, i32
  }
  func.func @transform_12(%arg0: i32) -> (i32, i32) {
    %c0_i32 = arith.constant 0 : i32
    %c0_i32_0 = arith.constant 0 : i32
    %c0_i32_1 = arith.constant 0 : i32
    return %c0_i32, %c0_i32_0 : i32, i32
  }
  func.func @transform_13(%arg0: i32) -> (i32, i32, i32) {
    %c0_i32 = arith.constant 0 : i32
    %c0_i32_0 = arith.constant 0 : i32
    %c0_i32_1 = arith.constant 0 : i32
    return %arg0, %c0_i32, %c0_i32_0 : i32, i32, i32
  }
}

</mosaic_0001>

<bundles_post_ra>
// kernel: tpu_custom_call.1
= control target key start
LH: loop header
LB: loop body
LE: loop exit
PB: predicated region body
PF: predicated region fallthrough
CT: control target
= control target key end

     0   :  { %s5452_s0 = inlined_call_operand.hbm [shape: f32[16,8,32], index: 0, kind: input, shape index: {}]   ;;  %s5453_s1 = inlined_call_operand.vmem [shape: f32[1,32], index: 1, kind: input, shape index: {}]   ;;  %s5454_s2 = inlined_call_operand.vmem [shape: bf16[32,160], index: 2, kind: input, shape index: {}]   ;;  %s5455_s3 = inlined_call_operand.vmem [shape: bf16[32,32], index: 3, kind: input, shape index: {}]   ;;  %s5456_s4 = inlined_call_operand.vmem [shape: f32[1,32], index: 4, kind: input, shape index: {}]   ;;  %s5457_s5 = inlined_call_operand.vmem [shape: bf16[32,32], index: 5, kind: input, shape index: {}]   ;;  %s5458_s6 = inlined_call_operand.vmem [shape: f32[8,32], index: 6, kind: input, shape index: {}]   ;;  %s5459_s7 = inlined_call_operand.hbm [shape: f32[8,32], index: 7, kind: input, shape index: {}]   ;;  %s5460_s8 = inlined_call_operand.vmem [shape: f32[1,32], index: 8, kind: input, shape index: {}]   ;;  %s5461_s9 = inlined_call_operand.vmem [shape: bf16[32,128], index: 9, kind: input, shape index: {}]   ;;  %s5462_s10 = inlined_call_operand.vmem [shape: f32[1,128], index: 10, kind: input, shape index: {}]   ;;  %s5463_s11 = inlined_call_operand.vmem [shape: bf16[128,32], index: 11, kind: input, shape index: {}]   ;;  %s5464_s12 = inlined_call_operand.vmem [shape: f32[1,32], index: 12, kind: input, shape index: {}]   ;;  %s5465_s13 = inlined_call_operand.hbm [shape: f32[16,8,32], index: 13, kind: output, shape index: {}]  }
   0x1   :  { %5479 = sst [smem:[#allocation17_spill]] %s5464_s12 }
   0x2   :  { %5480 = sst [smem:[#allocation18_spill]] %s5465_s13 }
   0x3   :  { %18 = vsyncpa [#allocation3], 0 }
   0x4   :  { %20 = vsyncpa [#allocation3 + $0x1], 0 }
   0x5   :  { %21 = vsyncpa [#allocation6], 0 }
   0x6   :  { %22 = vsyncpa [#allocation4], 0 }
   0x7   :  { %24 = vsyncpa [#allocation4 + $0x1], 0  ;;  %s4384_s25 = smov 0   ;;  %s4386_s26 = smov 0  }
   0x8   :  { %s4388_s27 = smov 0   ;;  %s4390_s28 = smov 0  }
   0x9 LB: > { %5481 = sst [smem:[#allocation11_spill]] %s4284_s25  ;;  %s4405_s29 = sadd.s32 4294967295, %s4296_s28   ;;  %s4296_s28 = sphi %s4390_s28, %s5508_s28   ;;  %s4292_s27 = sphi %s4388_s27, %s5510_s27   ;;  %s4288_s26 = sphi %s4386_s26, %s5512_s26   ;;  %s4284_s25 = sphi %s4384_s25, %s5511_s25  }
   0xa   : > { %5482 = sst [smem:[#allocation12_spill]] %s4292_s27  ;;  %s3455_s30 = sadd.s32 4294967294, %s4296_s28  }
   0xb   : > { %s4409_s14 = sadd.s32 1, %s4296_s28   ;;  %s37_s15 = sadd.s32 1, %s4292_s27 }
   0xc   : > { %5483 = sst [smem:[#allocation13_spill]] %s4409_s14  ;;  %s34_s16 = ssub.s32 %s4296_s28, %s4409_s14 }
   0xd   : > { %p44_p0 = scmp.ne.s32.totalorder %s4292_s27, %s4288_s26  ;;  %p35_p1 = scmp.eq.s32.totalorder %s34_s16, 0 }
   0xe   : > { %p45_p2 = scmp.eq.s32.totalorder %s4296_s28, 0  ;;  %p50_p3 = scmp.ne.s32.totalorder %s4288_s26, %s4284_s25 }
   0xf   : > { %p5466_p4 = scmp.eq.s32.totalorder %s4405_s29, 0  ;;  %p326_p7 = scmp.eq.s32.totalorder %s4405_s29, 1 }
  0x10   : > { %s4421_s17 = scalar_select %p35_p1, %s4292_s27, %s37_s15  }
  0x11   : > { %p4423_p5 = por %p45_p2, %p44_p0  ;;  %p4429_p6 = por %p5466_p4, %p50_p3 }
  0x12   : > { %5484 = sst [smem:[#allocation14_spill]] %s4421_s17  ;;  %p332_p8 = scmp.eq.s32.totalorder %s3455_s30, 1 }
  0x13   : > { %s5486_s19 = scalar_select %p4429_p6, 1, 0 }
  0x14   : > { %p3456_p9 = scmp.ge.s32.totalorder %s4296_s28, 1  ;;  %p339_p10 = scmp.lt.s32.totalorder %s4296_s28, 3 }
  0x15   : > { %p4436_p11 = por %p326_p7, %p44_p0  ;;  %p4440_p12 = por %p332_p8, %p50_p3 }
  0x16   : > { %p4444_p13 = pnand %p3456_p9, %p339_p10  ;;  %s4298_s23 = smov [#allocation5]  }
  0x17   : > { %s5487_s20 = scalar_select %p4436_p11, 1, 0 }
  0x18   : > { %s5489_s21 = scalar_select %p4440_p12, 1, 0 }
  0x19   : > { %5488 = sst [smem:[#allocation15_spill]] %s5487_s20  ;;  %p3934_p2 = pneg %p4444_p13 }
  0x1a   : > { %5490 = sst [smem:[#allocation16_spill]] %s5489_s21  ;;  %s370_s24 = sshll.u32 %s4298_s23, 4  ;;  %s371_s24 = int_to_ptr.vmem [resolvable:$true] %s370_s24 }
  0x1b   : > { %s5491_s22 = scalar_select %p4444_p13, 1, 0 }
  0x1c   : > { %p3947_p4 = scmp.lt.s32.totalorder %s4296_s28, 2  ;;  %p5492_p0 = scmp.eq.s32.totalorder %s4405_s29, 0 }
  0x1d   : > { %s396_s15 = sand.u32 1, %s4292_s27   ;;  %s4168_s25 = scalar_lea.hbm %s5459_s7, 128 }
  0x1e   : > { %p4454_p7 = pnand %p3934_p2, %p5492_p0  ;;  %p4461_p3 = pnand %p3947_p4, %p4423_p5 }
  0x1f   : > { %s3459_s17 = sshll.u32 %s396_s15, 6  ;;  %p4169_p8 = scmp.ne.s32.totalorder %s5459_s7, %s4168_s25 }
  0x20   : > { %s5494_s16 = scalar_select %p4461_p3, 1, 0 }
  0x21   : > { %p4170_p9 = pneg %p4454_p7  ;;  %p4175_p4 = scmp.lt.u32.totalorder %s4168_s25, %s5459_s7 }
  0x23   : > { %p4171_p10 = pnand %p4170_p9, %p4169_p8 }
  0x25   : > { %p4172_p2 = pneg %p4171_p10 }
  0x27   : > { %p4177_p5 = pnand %p4175_p4, %p4172_p2 }
  0x29   : > { %4180 = shalt.err (!%p4177_p5)
}
  0x2a   : > { %s4181_s18 = scalar_lea.vmem %s371_s24, 128  ;;  %p4189_p11 = scmp.lt.s32.totalorder %s371_s24, %s371_s24 }
  0x2b   : > { %p4182_p0 = scmp.ne.s32.totalorder %s371_s24, %s4181_s18  ;;  %p4190_p6 = scmp.lt.s32.totalorder %s4181_s18, %s4181_s18 }
  0x2d   : > { %p4184_p1 = pnand %p4182_p0, %p4170_p9  ;;  %p4191_p13 = por %p4190_p6, %p4189_p11 }
  0x2f   : > { %p4185_p12 = pneg %p4184_p1 }
  0x31   : > { %p4192_p3 = pnand %p4191_p13, %p4185_p12 }
  0x33   : > { %4195 = shalt.err (!%p4192_p3)
}
  0x34   : > { %3937 = dma.hbm_to_vmem [thread:$0]  (!%p4454_p7), %s5459_s7, 128, %s371_s24, [#allocation6]  }
  0x35   : > { %s3554_s25 = sshll.u32 %s4296_s28, 10  ;;  %s400_s27 = scalar_lea.vmem [#allocation2], %s3459_s17 }
  0x36   : > { %s407_s20 = sshll.u32 %s400_s27, 4  ;;  %s4485_s12 = scalar_lea.hbm %s5452_s0, %s3554_s25  ;;  %s4487_s20 = int_to_ptr.vmem [resolvable:$true] %s407_s20 }
  0x37   : > { %s4489_s30 = scalar_lea.sflag [#allocation3], %s396_s15  ;;  %s4196_s18 = scalar_lea.hbm %s4485_s12, 1024 }
  0x38   : > { %p4197_p6 = scmp.ne.s32.totalorder %s4485_s12, %s4196_s18  ;;  %p5495_p11 = scmp.ne.s32.totalorder %s5494_s16, 0 }
  0x39   : > { %s4201_s13 = scalar_lea.hbm %s5452_s0, 2048  ;;  %p4202_p7 = scmp.lt.u32.totalorder %s4485_s12, %s5452_s0 }
  0x3a   : > { %p4198_p12 = pneg %p5495_p11  ;;  %p4203_p3 = scmp.lt.u32.totalorder %s4201_s13, %s4196_s18 }
  0x3b   : > { %p4205_p9 = scmp.lt.u32.totalorder %s4196_s18, %s4485_s12 }
  0x3c   : > { %p4199_p13 = pnand %p4198_p12, %p4197_p6  ;;  %p4204_p8 = por %p4203_p3, %p4202_p7 }
  0x3e   : > { %p4200_p1 = pneg %p4199_p13  ;;  %p4206_p10 = por %p4205_p9, %p4204_p8 }
  0x40   : > { %p4207_p2 = pnand %p4206_p10, %p4200_p1 }
  0x42   : > { %4210 = shalt.err (!%p4207_p2)
}
  0x43   : > { %s4211_s15 = scalar_lea.vmem %s4487_s20, 1024  ;;  %s4299_s27 = smov [#allocation2]  }
  0x44   : > { %p4212_p4 = scmp.ne.s32.totalorder %s4487_s20, %s4211_s15  ;;  %s4216_s21 = sshll.u32 %s4299_s27, 4  ;;  %s4217_s21 = int_to_ptr.vmem [resolvable:$false] %s4216_s21 }
  0x45   : > { %s4218_s23 = scalar_lea.vmem %s4217_s21, 2048  ;;  %p4219_p6 = scmp.lt.s32.totalorder %s4487_s20, %s4217_s21 }
  0x46   : > { %p4214_p5 = pnand %p4212_p4, %p4198_p12  ;;  %p4220_p13 = scmp.lt.s32.totalorder %s4218_s23, %s4211_s15 }
  0x48   : > { %p4215_p0 = pneg %p4214_p5  ;;  %p4221_p7 = por %p4220_p13, %p4219_p6 }
  0x4a   : > { %p4222_p3 = pnand %p4221_p7, %p4215_p0 }
  0x4c   : > { %4225 = shalt.err (!%p4222_p3)
}
  0x4d   : > { %s4300_s18 = smov 128   ;;  %s4301_s17 = smov 8  }
  0x4e   : > { %3941 = dma.hbm_to_vmem [thread:$0]  (!%p5495_p11), %s4485_s12, 1024, %s4487_s20, %s4489_s30, %s4300_s18, %s4300_s18, %s4301_s17  }
  0x4f   : > { %p5496_p12 = scmp.ne.s32.totalorder %s5491_s22, 0 }
  0x50   : > { %s4520_s24 = sand.u32 (!%p5496_p12), 1, %s4288_s26   ;;  %p5497_p1 = scmp.ne.s32.totalorder (!%p5496_p12), %s5486_s19, 0 }
  0x51   : > { %419 = sbr.rel (%p5496_p12) target bundleno = 3075 (0xc03), region = 72  ;;  %s3463_s13 = sshll.u32 (!%p5496_p12), %s4520_s24, 6 }
  0x52   : > { %s422_s14 = scalar_lea.sflag (!%p5496_p12), [#allocation3], %s4520_s24  ;;  %s4526_s25 = scalar_lea.vmem (!%p5496_p12), [#allocation2], %s3463_s13 }
  0x58   : > { %4271 = dma.done.wait (%p5497_p1), %s422_s14, 1024  }
  0x59   : > { %4273 = vsyncadd (%p5497_p1), %s422_s14, 4294966272  ;;  %p5498_p11 = scmp.eq.s32.totalorder %s4405_s29, 0 }
  0x5b   : > { %4275 = dma.done.wait (%p5498_p11), [#allocation6], 128   ;;  %p5499_p8 = pmov %p5498_p11 }
  0x5c   : > { %v4537_v0 = vld [vmem:[%s4526_s25] sm:$0xff]  ;;  %vm492_vm0 = vcmask 261120   ;;  %v4540_v1 = vld [vmem:[%s4526_s25 + $0x8] sm:$0xff]  ;;  %v4543_v2 = vld [vmem:[%s4526_s25 + $0x10] sm:$0xff]  ;;  %v4302_v28 = vmov 0   ;;  %s4303_s19 = smov 32  }
  0x5d   : > { %4277 = vsyncadd (%p5499_p8), [#allocation6], 4294967168  ;;  %v484_v3 = vmul.f32 %v4537_v0, %v4537_v0  ;;  %v485_v4 = vmul.f32 %v4540_v1, %v4540_v1  ;;  %v486_v5 = vmul.f32 %v4543_v2, %v4543_v2  ;;  %v4552_v6 = vld [vmem:[%s4526_s25 + $0x18] sm:$0xff]  ;;  %v4555_v7 = vld [vmem:[%s4526_s25 + $0x28] sm:$0xff]  ;;  %635 = vmatprep.mubr.bf16.mxu0 %v4302_v28  ;;  %s4304_s20 = smov 96   ;;  %vm4306_vm1 = vmmov 0  }
  0x5e   : > { %v4558_v8 = vld [vmem:[%s4526_s25 + $0x20] sm:$0xff]  ;;  %v487_v9 = vmul.f32 %v4552_v6, %v4552_v6  ;;  %v489_v10 = vmul.f32 %v4555_v7, %v4555_v7  ;;  %v4567_v12 = vld [vmem:[%s4526_s25 + $0x38] sm:$0xff]  ;;  %v4570_v13 = vld [vmem:[%s4526_s25 + $0x30] sm:$0xff]  ;;  %s4307_s30 = smov 64   ;;  %vm965_vm2 = vcmask 130048   ;;  %vm1466_vm3 = vcmask 1043456  }
  0x5f   : > { %v488_v11 = vmul.f32 %v4558_v8, %v4558_v8  ;;  %v493_v14 = vsel %vm492_vm0, %v484_v3, 0.0  ;;  %v499_v15 = vsel %vm492_vm0, %v486_v5, 0.0  ;;  %v491_v16 = vmul.f32 %v4567_v12, %v4567_v12  ;;  %v3996_v24 = vld [vmem:[%s5454_s2 + $0x4] ss:$8 sps:$4 sm:$0xff]   ;;  %v3998_v25 = vld [vmem:[%s5454_s2] ss:$8 sps:$4 sm:$0xff]  }
  0x60   : > { %494 = vadd.xlane.f32.xlu0 %v493_v14  ;;  %v496_v17 = vsel %vm492_vm0, %v485_v4, 0.0  ;;  %500 = vadd.xlane.f32.xlu1 %v499_v15  ;;  %v502_v18 = vsel %vm492_vm0, %v487_v9, 0.0  ;;  %v490_v19 = vmul.f32 %v4570_v13, %v4570_v13  ;;  %v508_v20 = vsel %vm492_vm0, %v489_v10, 0.0  ;;  %v3999_v26 = vld [vmem:[%s5454_s2 + $0x14] ss:$8 sps:$4 sm:$0xff]   ;;  %v4600_v29 = vld [vmem:[%s5455_s3] sm:$0xff]  }
  0x61   : > { %v505_v21 = vsel %vm492_vm0, %v488_v11, 0.0  ;;  %v514_v22 = vsel %vm492_vm0, %v491_v16, 0.0  ;;  %603 = vmatprep.subr.bf16.mxu0 %v3996_v24  ;;  %v4001_v27 = vld [vmem:[%s5454_s2 + $0x10] ss:$8 sps:$4 sm:$0xff]   ;;  %3914 = vmatprep.subr.bf16.mxu1 %v4600_v29  ;;  %v4607_v30 = vld [vmem:[%s5455_s3 + $0x8] sm:$0xff]   ;;  %v4615_v31 = vld [vmem:[%s5458_s6] sm:$0xff] }
  0x62   : > { %v511_v23 = vsel %vm492_vm0, %v490_v19, 0.0  ;;  %604 = vmatpush1.bf16.msra.mxu0 %v3998_v25  ;;  %3916 = vmatpush3.bf16.msra.mxu1 %v4600_v29  ;;  %v3466_v56 = vld [vmem:[%s5453_s1] ss:$0 sm:$0xff]  ;;  %vm1363_vm4 = vcmask 64512   ;;  %s4308_s15 = smov 80   ;;  %s4309_s27 = smov 112  }
  0x63   : > { %605 = vmatprep.subr.bf16.mxu0 %v3999_v26  ;;  %3915 = vmatprep.subr.bf16.mxu1 %v4607_v30  ;;  %s4310_s18 = smov 48   ;;  %s5500_s12 = sld [smem:[#allocation17_spill]] }
  0x64   : > { %497 = vadd.xlane.f32.xlu0 %v496_v17  ;;  %503 = vadd.xlane.f32.xlu1 %v502_v18  ;;  %s5501_s22 = sld [smem:[#allocation15_spill]]  ;;  %s4311_s21 = smov [#allocation7]  }
  0x65   : > { %s4230_s23 = sshll.u32 %s4311_s21, 4  ;;  %s4231_s23 = int_to_ptr.vmem [resolvable:$false] %s4230_s23 }
  0x66   : > { %606 = vmatpush1.bf16.msra.mxu0 %v4001_v27  ;;  %3917 = vmatpush3.bf16.msra.mxu1 %v4607_v30 }
  0x67   : > { %3654 = vmatprep.subr.bf16.mxu0 %v4600_v29 }
  0x68   : > { %509 = vadd.xlane.f32.xlu1 %v508_v20  ;;  %506 = vadd.xlane.f32.xlu0 %v505_v21 }
  0x6a   : > { %p5503_p10 = scmp.ne.s32.totalorder %s5501_s22, 0 }
  0x6c   : > { %515 = vadd.xlane.f32.xlu1 %v514_v22  ;;  %512 = vadd.xlane.f32.xlu0 %v511_v23 }
  0x82   : > { %875 = vrot.lane.b32.xlu0 %v4615_v31, %s4303_s19 }
  0xed   : > { %v495_v32 = vpop.xlane.xlu0 %494  ;;  %v501_v33 = vpop.xlane.xlu1 %500 }
  0xee   : > { %v517_v34 = vmax.f32 %v495_v32, 1e-24  ;;  %v519_v35 = vmax.f32 %v501_v33, 1e-24 }
  0xf0   : > { %4016 = vrsqrt.f32 %v517_v34 }
  0xf1   : > { %v498_v36 = vpop.xlane.xlu0 %497  ;;  %4018 = vrsqrt.f32 %v519_v35  ;;  %v504_v37 = vpop.xlane.xlu1 %503 }
  0xf2   : > { %v518_v38 = vmax.f32 %v498_v36, 1e-24  ;;  %v520_v39 = vmax.f32 %v504_v37, 1e-24 }
  0xf4   : > { %4020 = vrsqrt.f32 %v518_v38 }
  0xf5   : > { %4022 = vrsqrt.f32 %v520_v39  ;;  %v510_v40 = vpop.xlane.xlu1 %509  ;;  %v507_v41 = vpop.xlane.xlu0 %506 }
  0xf6   : > { %v522_v42 = vmax.f32 %v510_v40, 1e-24  ;;  %v521_v43 = vmax.f32 %v507_v41, 1e-24 }
  0xf8   : > { %4024 = vrsqrt.f32 %v522_v42 }
  0xf9   : > { %4026 = vrsqrt.f32 %v521_v43  ;;  %v516_v44 = vpop.xlane.xlu1 %515  ;;  %v513_v45 = vpop.xlane.xlu0 %512 }
  0xfa   : > { %v4017_v46 = vpop.eup %4016  ;;  %v524_v47 = vmax.f32 %v516_v44, 1e-24  ;;  %v523_v48 = vmax.f32 %v513_v45, 1e-24 }
  0xfb   : > { %v4019_v49 = vpop.eup %4018  ;;  %v533_v50 = vmul.f32 %v4017_v46, %v4537_v0 }
  0xfc   : > { %4028 = vrsqrt.f32 %v524_v47  ;;  %v535_v52 = vmul.f32 %v4019_v49, %v4543_v2 }
  0xfd   : > { %4030 = vrsqrt.f32 %v523_v48  ;;  %v541_v55 = vmul.f32 5.656854, %v533_v50 }
  0xfe   : > { %v4021_v51 = vpop.eup %4020  ;;  %v543_v60 = vmul.f32 5.656854, %v535_v52 }
  0xff   : > { %v4023_v53 = vpop.eup %4022  ;;  %v534_v54 = vmul.f32 %v4021_v51, %v4540_v1  ;;  %v555_v62 = vmul.f32 %v3466_v56, %v541_v55  ;;  %v4305_v55 = vmov 0.0  }
 0x100   : > { %v536_v57 = vmul.f32 %v4023_v53, %v4552_v6  ;;  %v557_v11 = vmul.f32 %v3466_v56, %v543_v60  ;;  %3666 = vmatprep.subr.bf16.mxu1 %v4305_v55 }
 0x101   : > { %v542_v58 = vmul.f32 5.656854, %v534_v54 }
 0x102   : > { %v4025_v59 = vpop.eup %4024  ;;  %v544_v0 = vmul.f32 5.656854, %v536_v57 }
 0x103   : > { %v4027_v61 = vpop.eup %4026  ;;  %v556_v63 = vmul.f32 %v3466_v56, %v542_v58  ;;  %v538_v3 = vmul.f32 %v4025_v59, %v4555_v7 }
 0x104   : > { %v537_v2 = vmul.f32 %v4027_v61, %v4558_v8  ;;  %v558_v6 = vmul.f32 %v3466_v56, %v544_v0 }
 0x105   : > { %v563_v4 = vpack.c.bf16 %v556_v63, %v555_v62  ;;  %v546_v1 = vmul.f32 5.656854, %v538_v3 }
 0x106   : > { %v4029_v5 = vpop.eup %4028  ;;  %v545_v9 = vmul.f32 5.656854, %v537_v2  ;;  %v564_v19 = vpack.c.bf16 %v558_v6, %v557_v11 }
 0x107   : > { %v4031_v10 = vpop.eup %4030  ;;  %3471 = vmatmul.mubr.msk.bf16.vlgmr.msra.gmra.mrb[0].mxu0 %vm492_vm0, %v563_v4  ;;  %v560_v14 = vmul.f32 %v3466_v56, %v546_v1  ;;  %v540_v15 = vmul.f32 %v4029_v5, %v4567_v12 }
 0x108   : > { %645 = vmatprep.mubr.bf16.mxu0 %v4302_v28  ;;  %v559_v16 = vmul.f32 %v3466_v56, %v545_v9  ;;  %v539_v17 = vmul.f32 %v4031_v10, %v4570_v13  ;;  %3655 = vmatpush3.bf16.msra.mxu0 %v4600_v29  ;;  %v813_v13 = vld [vmem:[#allocation5] sm:$0xff] }
 0x109   : > { %v548_v7 = vmul.f32 5.656854, %v540_v15  ;;  %3656 = vmatprep.subr.bf16.mxu0 %v4607_v30 }
 0x10a   : > { %v565_v8 = vpack.c.bf16 %v560_v14, %v559_v16  ;;  %v547_v18 = vmul.f32 5.656854, %v539_v17 }
 0x10b   : > { %v562_v20 = vmul.f32 %v3466_v56, %v548_v7 }
 0x10c   : > { %v561_v21 = vmul.f32 %v3466_v56, %v547_v18  ;;  %3657 = vmatpush3.bf16.msra.mxu0 %v4607_v30  ;;  %3662 = vmatprep.mubr.msk.bf16.mxu1 %vm492_vm0, %v565_v8  ;;  %v876_v56 = vpop.permute.xlu0 %875 }
 0x10d   : > { %3678 = vmatprep.subr.bf16.mxu0 %v4305_v55 }
 0x10e   : > { %v566_v12 = vpack.c.bf16 %v562_v20, %v561_v21 }
 0x10f   : > { %3472 = vmatmul.mubr.msk.bf16.gmra.mrb[4].mxu0 %vm492_vm0, %v564_v19 }
 0x110   : > { %655 = vmatprep.mubr.bf16.mxu0 %v4302_v28  ;;  %3663 = vmatmul.mubr.msk.bf16.vlgmr.msra.gmra.mrb[0].mxu1 %vm492_vm0, %v566_v12 }
 0x111   : > { %3668 = vmatprep.mubr.msk.bf16.mxu1 %vm4306_vm1, %v4305_v55 }
 0x117   : > { %3473 = vmatmul.mubr.msk.bf16.gmra.mrb[8].mxu0 %vm492_vm0, %v565_v8 }
 0x118   : > { %665 = vmatprep.mubr.bf16.mxu0 %v4302_v28 }
 0x11f   : > { %3474 = vmatmul.mubr.msk.bf16.gmra.mrb[12].mxu0 %vm492_vm0, %v566_v12 }
 0x120   : > { %3658 = vmatprep.mubr.msk.bf16.mxu0 %vm492_vm0, %v563_v4 }
 0x127   : > { %3659 = vmatmul.mubr.msk.bf16.vlgmr.msra.gmra.mrb[16].mxu0 %vm492_vm0, %v564_v19 }
 0x128   : > { %3680 = vmatprep.mubr.msk.bf16.mxu0 %vm4306_vm1, %v4305_v55 }
 0x1da   : > { %v4644_v22 = vpop.f32.mrb[0].mxu0 }
 0x1db   : > { %v639_v23 = vpop.f32.mrb[1].mxu0  ;;  %v878_v57 = vmul.f32 %v876_v56, %v4644_v22 }
 0x1dc   : > { %v886_v24 = vmul.f32 %v813_v13, %v639_v23  ;;  %v4646_v25 = vpop.f32.mrb[2].mxu0 }
 0x1dd   : > { %v643_v26 = vpop.f32.mrb[3].mxu0  ;;  %v879_v63 = vmul.f32 %v876_v56, %v4646_v25 }
 0x1de   : > { %902 = vrot.lane.b32.xlu1 %v886_v24, %s4303_s19  ;;  %v887_v30 = vmul.f32 %v813_v13, %v643_v26 }
 0x1e2   : > { %823 = vrot.lane.b32.xlu1 %v813_v13, %s4304_s20  ;;  %v4650_v27 = vpop.f32.mrb[4].mxu0 }
 0x1e3   : > { %v649_v28 = vpop.f32.mrb[5].mxu0  ;;  %v4652_v29 = vpop.f32.mrb[0].mxu1  ;;  %v880_v4 = vmul.f32 %v876_v56, %v4650_v27 }
 0x1e4   : > { %v888_v32 = vmul.f32 %v813_v13, %v649_v28  ;;  %v4654_v33 = vpop.f32.mrb[6].mxu0  ;;  %v4656_v34 = vpop.f32.mrb[1].mxu1 }
 0x1e5   : > { %v653_v35 = vpop.f32.mrb[7].mxu0  ;;  %v4658_v36 = vpop.f32.mrb[2].mxu1  ;;  %v881_v10 = vmul.f32 %v876_v56, %v4654_v33 }
 0x1e6   : > { %904 = vrot.lane.b32.xlu1 %v887_v30, %s4303_s19  ;;  %906 = vrot.lane.b32.xlu0 %v888_v32, %s4303_s19  ;;  %v4662_v37 = vpop.f32.mrb[3].mxu1  ;;  %v889_v38 = vmul.f32 %v813_v13, %v653_v35 }
 0x1ea   : > { %908 = vrot.lane.b32.xlu1 %v889_v38, %s4303_s19  ;;  %v4665_v39 = vpop.f32.mrb[8].mxu0 }
 0x1eb   : > { %v659_v40 = vpop.f32.mrb[9].mxu0  ;;  %v882_v17 = vmul.f32 %v876_v56, %v4665_v39 }
 0x1ec   : > { %v890_v41 = vmul.f32 %v813_v13, %v659_v40  ;;  %v4667_v42 = vpop.f32.mrb[10].mxu0 }
 0x1ed   : > { %v663_v43 = vpop.f32.mrb[11].mxu0  ;;  %v883_v7 = vmul.f32 %v876_v56, %v4667_v42 }
 0x1ee   : > { %v891_v44 = vmul.f32 %v813_v13, %v663_v43  ;;  %910 = vrot.lane.b32.xlu0 %v890_v41, %s4303_s19 }
 0x1f0   : > { %912 = vrot.lane.b32.xlu1 %v891_v44, %s4303_s19 }
 0x1f2   : > { %v4671_v45 = vpop.f32.mrb[12].mxu0 }
 0x1f3   : > { %v669_v46 = vpop.f32.mrb[13].mxu0  ;;  %v884_v24 = vmul.f32 %v876_v56, %v4671_v45 }
 0x1f4   : > { %v892_v47 = vmul.f32 %v813_v13, %v669_v46  ;;  %v4673_v48 = vpop.f32.mrb[14].mxu0  ;;  %v4749_v46 = vpack.c.bf16 %v4646_v25, %v4646_v25 }
 0x1f5   : > { %v673_v49 = vpop.f32.mrb[15].mxu0  ;;  %v885_v26 = vmul.f32 %v876_v56, %v4673_v48 }
 0x1f6   : > { %v893_v50 = vmul.f32 %v813_v13, %v673_v49  ;;  %914 = vrot.lane.b32.xlu0 %v892_v47, %s4303_s19  ;;  %v4753_v47 = vpack.c.bf16 %v4644_v22, %v4644_v22  ;;  %v4761_v49 = vpack.c.bf16 %v4650_v27, %v4650_v27 }
 0x1f8   : > { %916 = vrot.lane.b32.xlu1 %v893_v50, %s4303_s19  ;;  %v4767_v50 = vpack.c.bf16 %v4654_v33, %v4654_v33 }
 0x1fa   : > { %v4677_v51 = vpop.f32.mrb[16].mxu0 }
 0x1fb   : > { %v4679_v52 = vpop.f32.mrb[17].mxu0 }
 0x1fc   : > { %v4681_v53 = vpop.f32.mrb[18].mxu0 }
 0x1fd   : > { %v4683_v54 = vpop.f32.mrb[19].mxu0 }
 0x250   : > { %v903_v58 = vpop.permute.xlu1 %902 }
 0x251   : > { %v926_v59 = vadd.f32 %v903_v58, %v878_v57  ;;  %v814_v58 = vmul.f32 %v4615_v31, %v4644_v22 }
 0x253   : > { %v4692_v60 = vpack.c.bf16 %v926_v59, %v926_v59 }
 0x254   : > { %v824_v61 = vpop.permute.xlu1 %823 }
 0x255   : > { %963 = vrot.lane.b32.xlu0 %v4692_v60, %s4304_s20  ;;  %v826_v62 = vmul.f32 %v824_v61, %v4644_v22  ;;  %v827_v1 = vmul.f32 %v824_v61, %v4646_v25  ;;  %v829_v20 = vmul.f32 %v824_v61, %v4654_v33  ;;  %v828_v21 = vmul.f32 %v824_v61, %v4650_v27 }
 0x256   : > { %v831_v35 = vmul.f32 %v824_v61, %v4667_v42  ;;  %v830_v38 = vmul.f32 %v824_v61, %v4665_v39  ;;  %v833_v43 = vmul.f32 %v824_v61, %v4673_v48  ;;  %v832_v44 = vmul.f32 %v824_v61, %v4671_v45 }
 0x257   : > { %842 = vrot.lane.b32.xlu1 %v826_v62, %s4303_s19 }
 0x258   : > { %v905_v0 = vpop.permute.xlu1 %904  ;;  %v907_v3 = vpop.permute.xlu0 %906 }
 0x259   : > { %v927_v2 = vadd.f32 %v905_v0, %v879_v63  ;;  %v928_v9 = vadd.f32 %v907_v3, %v880_v4  ;;  %v815_v3 = vmul.f32 %v4615_v31, %v4646_v25  ;;  %v816_v25 = vmul.f32 %v4615_v31, %v4650_v27 }
 0x25b   : > { %v4701_v5 = vpack.c.bf16 %v927_v2, %v927_v2  ;;  %844 = vrot.lane.b32.xlu1 %v827_v1, %s4303_s19  ;;  %v4707_v14 = vpack.c.bf16 %v928_v9, %v928_v9 }
 0x25c   : > { %v909_v11 = vpop.permute.xlu1 %908 }
 0x25d   : > { %v929_v6 = vadd.f32 %v909_v11, %v881_v10  ;;  %1013 = vrot.lane.b32.xlu0 %v4701_v5, %s4304_s20 }
 0x25f   : > { %v4709_v15 = vpack.c.bf16 %v929_v6, %v929_v6 }
 0x260   : > { %v911_v16 = vpop.permute.xlu0 %910 }
 0x261   : > { %1111 = vrot.lane.b32.xlu1 %v4709_v15, %s4304_s20  ;;  %1062 = vrot.lane.b32.xlu0 %v4707_v14, %s4304_s20  ;;  %v930_v18 = vadd.f32 %v911_v16, %v882_v17  ;;  %v817_v17 = vmul.f32 %v4615_v31, %v4654_v33 }
 0x262   : > { %v913_v8 = vpop.permute.xlu1 %912 }
 0x263   : > { %v931_v19 = vadd.f32 %v913_v8, %v883_v7  ;;  %v4721_v12 = vpack.c.bf16 %v930_v18, %v930_v18 }
 0x265   : > { %848 = vrot.lane.b32.xlu1 %v829_v20, %s4303_s19  ;;  %846 = vrot.lane.b32.xlu0 %v828_v21, %s4303_s19  ;;  %v4723_v13 = vpack.c.bf16 %v931_v19, %v931_v19  ;;  %v818_v21 = vmul.f32 %v4615_v31, %v4665_v39 }
 0x268   : > { %v915_v23 = vpop.permute.xlu0 %914 }
 0x269   : > { %1209 = vrot.lane.b32.xlu1 %v4723_v13, %s4304_s20  ;;  %1160 = vrot.lane.b32.xlu0 %v4721_v12, %s4304_s20  ;;  %v932_v30 = vadd.f32 %v915_v23, %v884_v24 }
 0x26a   : > { %v917_v28 = vpop.permute.xlu1 %916 }
 0x26b   : > { %v933_v32 = vadd.f32 %v917_v28, %v885_v26  ;;  %v4735_v40 = vpack.c.bf16 %v932_v30, %v932_v30  ;;  %v819_v28 = vmul.f32 %v4615_v31, %v4667_v42 }
 0x26d   : > { %852 = vrot.lane.b32.xlu1 %v831_v35, %s4303_s19  ;;  %850 = vrot.lane.b32.xlu0 %v830_v38, %s4303_s19  ;;  %v4737_v41 = vpack.c.bf16 %v933_v32, %v933_v32 }
 0x271   : > { %1307 = vrot.lane.b32.xlu1 %v4737_v41, %s4304_s20  ;;  %1258 = vrot.lane.b32.xlu0 %v4735_v40, %s4304_s20 }
 0x275   : > { %856 = vrot.lane.b32.xlu1 %v833_v43, %s4303_s19  ;;  %854 = vrot.lane.b32.xlu0 %v832_v44, %s4303_s19  ;;  %s471_s19 = scalar_lea.vmem [#allocation7], %s3463_s13 }
 0x276   : > { %s3372_s13 = sshll.u32 %s471_s19, 4  ;;  %s5404_s13 = int_to_ptr.vmem [resolvable:$true] %s3372_s13 }
 0x277   : > { %p4233_p5 = scmp.lt.s32.totalorder %s5404_s13, %s4231_s23 }
 0x279   : > { %1511 = vrot.lane.b32.xlu1 %v4749_v46, %s4307_s30  ;;  %1461 = vrot.lane.b32.xlu0 %v4753_v47, %s4307_s30 }
 0x27d   : > { %1560 = vrot.lane.b32.xlu1 %v4761_v49, %s4307_s30 }
 0x281   : > { %1609 = vrot.lane.b32.xlu1 %v4767_v50, %s4307_s30 }
 0x2c7   : > { %v964_v56 = vpop.permute.xlu0 %963 }
 0x2c8   : > { %v970_v57 = vsel %vm965_vm2, %v964_v56, 0 }
 0x2c9   : > { %v843_v59 = vpop.permute.xlu1 %842  ;;  %3667 = vmatpush3.bf16.xpose.msra.mxu1 %v970_v57  ;;  %v820_v57 = vmul.f32 %v4615_v31, %v4671_v45 }
 0x2ca   : > { %v866_v61 = vadd.f32 %v843_v59, %v814_v58  ;;  %3672 = vmatprep.subr.bf16.mxu1 %v4305_v55 }
 0x2cc   : > { %v4775_v62 = vpack.c.bf16 %v866_v61, %v866_v61 }
 0x2cd   : > { %v845_v63 = vpop.permute.xlu1 %844 }
 0x2ce   : > { %v867_v22 = vadd.f32 %v845_v63, %v815_v3  ;;  %v821_v63 = vmul.f32 %v4615_v31, %v4673_v48 }
 0x2cf   : > { %v1014_v0 = vpop.permute.xlu0 %1013 }
 0x2d0   : > { %v1019_v2 = vsel %vm965_vm2, %v1014_v0, 0  ;;  %3669 = vmatmul.mubr.msk.bf16.vlgmr.msra.gmra.mrb[4].mxu1 %vm965_vm2, %v4775_v62  ;;  %v4786_v10 = vpack.c.bf16 %v867_v22, %v867_v22 }
 0x2d1   : > { %3673 = vmatpush3.bf16.xpose.msra.mxu1 %v1019_v2  ;;  %3674 = vmatprep.mubr.msk.bf16.mxu1 %vm4306_vm1, %v4305_v55 }
 0x2d2   : > { %3684 = vmatprep.subr.bf16.mxu1 %v4305_v55 }
 0x2d3   : > { %v1112_v4 = vpop.permute.xlu1 %1111  ;;  %v1063_v1 = vpop.permute.xlu0 %1062 }
 0x2d4   : > { %v1068_v9 = vsel %vm965_vm2, %v1063_v1, 0  ;;  %v1117_v16 = vsel %vm965_vm2, %v1112_v4, 0 }
 0x2d5   : > { %3679 = vmatpush3.bf16.xpose.msra.mxu0 %v1068_v9 }
 0x2d6   : > { %3690 = vmatprep.subr.bf16.mxu0 %v4305_v55 }
 0x2d7   : > { %v849_v11 = vpop.permute.xlu1 %848  ;;  %v847_v6 = vpop.permute.xlu0 %846 }
 0x2d8   : > { %v868_v7 = vadd.f32 %v847_v6, %v816_v25  ;;  %3675 = vmatmul.mubr.msk.bf16.vlgmr.msra.gmra.mrb[8].mxu1 %vm965_vm2, %v4786_v10  ;;  %v869_v8 = vadd.f32 %v849_v11, %v817_v17 }
 0x2d9   : > { %3685 = vmatpush3.bf16.xpose.msra.mxu1 %v1117_v16  ;;  %3686 = vmatprep.mubr.msk.bf16.mxu1 %vm4306_vm1, %v4305_v55 }
 0x2da   : > { %v4798_v18 = vpack.c.bf16 %v868_v7, %v868_v7  ;;  %3696 = vmatprep.subr.bf16.mxu1 %v4305_v55  ;;  %v4806_v33 = vpack.c.bf16 %v869_v8, %v869_v8 }
 0x2db   : > { %v1210_v27 = vpop.permute.xlu1 %1209  ;;  %v1161_v19 = vpop.permute.xlu0 %1160 }
 0x2dc   : > { %v1166_v20 = vsel %vm965_vm2, %v1161_v19, 0  ;;  %3681 = vmatmul.mubr.msk.bf16.vlgmr.msra.gmra.mrb[20].mxu0 %vm965_vm2, %v4798_v18  ;;  %v1215_v26 = vsel %vm965_vm2, %v1210_v27, 0 }
 0x2dd   : > { %3691 = vmatpush3.bf16.xpose.msra.mxu0 %v1166_v20  ;;  %3692 = vmatprep.mubr.msk.bf16.mxu0 %vm4306_vm1, %v4305_v55 }
 0x2de   : > { %3702 = vmatprep.subr.bf16.mxu0 %v4305_v55 }
 0x2df   : > { %v853_v23 = vpop.permute.xlu1 %852  ;;  %v851_v24 = vpop.permute.xlu0 %850 }
 0x2e0   : > { %v870_v30 = vadd.f32 %v851_v24, %v818_v21  ;;  %3687 = vmatmul.mubr.msk.bf16.vlgmr.msra.gmra.mrb[12].mxu1 %vm965_vm2, %v4806_v33  ;;  %v871_v32 = vadd.f32 %v853_v23, %v819_v28 }
 0x2e1   : > { %3697 = vmatpush3.bf16.xpose.msra.mxu1 %v1215_v26  ;;  %3698 = vmatprep.mubr.msk.bf16.mxu1 %vm4306_vm1, %v4305_v55 }
 0x2e2   : > { %v4818_v35 = vpack.c.bf16 %v870_v30, %v870_v30  ;;  %3708 = vmatprep.subr.bf16.mxu1 %v4305_v55  ;;  %v4826_v56 = vpack.c.bf16 %v871_v32, %v871_v32 }
 0x2e3   : > { %v1308_v38 = vpop.permute.xlu1 %1307  ;;  %v1259_v43 = vpop.permute.xlu0 %1258 }
 0x2e4   : > { %v1264_v44 = vsel %vm965_vm2, %v1259_v43, 0  ;;  %3693 = vmatmul.mubr.msk.bf16.vlgmr.msra.gmra.mrb[24].mxu0 %vm965_vm2, %v4818_v35  ;;  %v1313_v61 = vsel %vm965_vm2, %v1308_v38, 0 }
 0x2e5   : > { %3703 = vmatpush3.bf16.xpose.msra.mxu0 %v1264_v44  ;;  %3704 = vmatprep.mubr.msk.bf16.mxu0 %vm4306_vm1, %v4305_v55 }
 0x2e6   : > { %3714 = vmatprep.subr.bf16.mxu0 %v4305_v55 }
 0x2e7   : > { %v857_v58 = vpop.permute.xlu1 %856  ;;  %v855_v59 = vpop.permute.xlu0 %854 }
 0x2e8   : > { %v872_v0 = vadd.f32 %v855_v59, %v820_v57  ;;  %3699 = vmatmul.mubr.msk.bf16.vlgmr.msra.gmra.mrb[16].mxu1 %vm965_vm2, %v4826_v56  ;;  %v873_v3 = vadd.f32 %v857_v58, %v821_v63 }
 0x2e9   : > { %3709 = vmatpush3.bf16.xpose.msra.mxu1 %v1313_v61  ;;  %3710 = vmatprep.mubr.msk.bf16.mxu1 %vm4306_vm1, %v4305_v55 }
 0x2ea   : > { %v4838_v2 = vpack.c.bf16 %v872_v0, %v872_v0  ;;  %3720 = vmatprep.subr.bf16.mxu1 %v4305_v55  ;;  %v4846_v1 = vpack.c.bf16 %v873_v3, %v873_v3 }
 0x2eb   : > { %v1462_v22 = vpop.permute.xlu0 %1461  ;;  %v1512_v31 = vpop.permute.xlu1 %1511 }
 0x2ec   : > { %v1468_v4 = vsel %vm1466_vm3, %v1462_v22, 0  ;;  %3705 = vmatmul.mubr.msk.bf16.vlgmr.msra.gmra.mrb[28].mxu0 %vm965_vm2, %v4838_v2  ;;  %v1517_v9 = vsel %vm1466_vm3, %v1512_v31, 0 }
 0x2ed   : > { %3715 = vmatpush3.bf16.msra.mxu0 %v1468_v4  ;;  %3716 = vmatprep.mubr.msk.bf16.mxu0 %vm4306_vm1, %v4305_v55 }
 0x2ee   : > { %3726 = vmatprep.subr.bf16.mxu0 %v4305_v55 }
 0x2f0   : > { %3711 = vmatmul.mubr.msk.bf16.vlgmr.msra.gmra.mrb[20].mxu1 %vm965_vm2, %v4846_v1 }
 0x2f1   : > { %3721 = vmatpush3.bf16.msra.mxu1 %v1517_v9  ;;  %3722 = vmatprep.mubr.msk.bf16.mxu1 %vm4306_vm1, %v4305_v55 }
 0x2f2   : > { %3732 = vmatprep.subr.bf16.mxu1 %v4305_v55 }
 0x3a3   : > { %v1006_v25 = vpop.f32.mrb[4].mxu1 }
 0x3a4   : > { %v1355_v11 = vmul.f32 0.25, %v1006_v25  ;;  %v3670_v6 = vpop.f32.mrb[5].mxu1 }
 0x3a5   : > { %v1009_v16 = vpop.f32.mrb[6].mxu1 }
 0x3a6   : > { %v3671_v17 = vpop.f32.mrb[7].mxu1  ;;  %v1364_v7 = vsel %vm1363_vm4, %v1355_v11, -inf }
 0x3a7   : > { %1365 = vmax.xlane.f32.xlu0 %v1364_v7 }
 0x3ab   : > { %v1055_v8 = vpop.f32.mrb[8].mxu1 }
 0x3ac   : > { %v1356_v27 = vmul.f32 0.25, %v1055_v8  ;;  %v3676_v19 = vpop.f32.mrb[9].mxu1 }
 0x3ad   : > { %v1058_v20 = vpop.f32.mrb[10].mxu1 }
 0x3ae   : > { %v3677_v21 = vpop.f32.mrb[11].mxu1  ;;  %v1367_v23 = vsel %vm1363_vm4, %v1356_v27, -inf }
 0x3af   : > { %1368 = vmax.xlane.f32.xlu1 %v1367_v23  ;;  %v1104_v24 = vpop.f32.mrb[20].mxu0 }
 0x3b0   : > { %v1357_v26 = vmul.f32 0.25, %v1104_v24  ;;  %v3682_v28 = vpop.f32.mrb[21].mxu0 }
 0x3b1   : > { %v1107_v30 = vpop.f32.mrb[22].mxu0 }
 0x3b2   : > { %v3683_v32 = vpop.f32.mrb[23].mxu0  ;;  %v1370_v38 = vsel %vm1363_vm4, %v1357_v26, -inf }
 0x3b3   : > { %v1153_v43 = vpop.f32.mrb[12].mxu1  ;;  %1371 = vmax.xlane.f32.xlu0 %v1370_v38 }
 0x3b4   : > { %v1358_v44 = vmul.f32 0.25, %v1153_v43  ;;  %v3688_v57 = vpop.f32.mrb[13].mxu1  ;;  %v4870_v43 = vpack.c.bf16 %v4667_v42, %v4667_v42 }
 0x3b5   : > { %v1156_v58 = vpop.f32.mrb[14].mxu1  ;;  %v4876_v57 = vpack.c.bf16 %v4665_v39, %v4665_v39 }
 0x3b6   : > { %v3689_v59 = vpop.f32.mrb[15].mxu1  ;;  %v1373_v61 = vsel %vm1363_vm4, %v1358_v44, -inf }
 0x3b7   : > { %1374 = vmax.xlane.f32.xlu0 %v1373_v61  ;;  %v1202_v63 = vpop.f32.mrb[24].mxu0  ;;  %v4884_v61 = vpop.permute.xlu1 %1560 }
 0x3b8   : > { %v1359_v0 = vmul.f32 0.25, %v1202_v63  ;;  %v3694_v3 = vpop.f32.mrb[25].mxu0 }
 0x3b9   : > { %v1205_v22 = vpop.f32.mrb[26].mxu0 }
 0x3ba   : > { %v3695_v4 = vpop.f32.mrb[27].mxu0  ;;  %v1376_v31 = vsel %vm1363_vm4, %v1359_v0, -inf }
 0x3bb   : > { %v1251_v9 = vpop.f32.mrb[16].mxu1  ;;  %1377 = vmax.xlane.f32.xlu0 %v1376_v31  ;;  %v4886_v22 = vpop.permute.xlu1 %1609 }
 0x3bc   : > { %v4860_v25 = vmul.f32 0.25, %v1251_v9  ;;  %v3700_v6 = vpop.f32.mrb[17].mxu1 }
 0x3bd   : > { %v1254_v16 = vpop.f32.mrb[18].mxu1 }
 0x3be   : > { %v3701_v17 = vpop.f32.mrb[19].mxu1  ;;  %v1379_v7 = vsel %vm1363_vm4, %v4860_v25, -inf }
 0x3bf   : > { %1380 = vmax.xlane.f32.xlu1 %v1379_v7  ;;  %v1300_v8 = vpop.f32.mrb[28].mxu0 }
 0x3c0   : > { %v4864_v19 = vmul.f32 0.25, %v1300_v8  ;;  %v3706_v20 = vpop.f32.mrb[29].mxu0 }
 0x3c1   : > { %v1303_v21 = vpop.f32.mrb[30].mxu0 }
 0x3c2   : > { %v3707_v23 = vpop.f32.mrb[31].mxu0  ;;  %v1382_v24 = vsel %vm1363_vm4, %v4864_v19, -inf }
 0x3c3   : > { %v1349_v28 = vpop.f32.mrb[20].mxu1  ;;  %1383 = vmax.xlane.f32.xlu0 %v1382_v24 }
 0x3c4   : > { %v3712_v30 = vpop.f32.mrb[21].mxu1  ;;  %v4880_v58 = vmul.f32 0.25, %v1349_v28 }
 0x3c5   : > { %v1352_v32 = vpop.f32.mrb[22].mxu1 }
 0x3c6   : > { %v3713_v38 = vpop.f32.mrb[23].mxu1  ;;  %v1385_v59 = vsel %vm1363_vm4, %v4880_v58, -inf }
 0x3d0   : > { %1707 = vrot.lane.b32.xlu1 %v4870_v43, %s4307_s30 }
 0x3d9   : > { %1658 = vrot.lane.b32.xlu0 %v4876_v57, %s4307_s30 }
 0x3f4   : > { %1386 = vmax.xlane.f32.xlu1 %v1385_v59  ;;  %v4910_v59 = vpack.c.bf16 %v4673_v48, %v4673_v48 }
 0x434   : > { %v1366_v42 = vpop.xlane.xlu0 %1365 }
 0x435   : > { %v1388_v63 = vsub.f32 %v1355_v11, %v1366_v42  ;;  %v4916_v42 = vpack.c.bf16 %v4671_v45, %v4671_v45 }
 0x437   : > { %v1396_v3 = vmul.f32 1.442695, %v1388_v63 }
 0x439   : > { %4032 = vpow2.f32 %v1396_v3 }
 0x43c   : > { %v1369_v4 = vpop.xlane.xlu1 %1368 }
 0x43d   : > { %v1389_v39 = vsub.f32 %v1356_v27, %v1369_v4 }
 0x43f   : > { %v1398_v31 = vmul.f32 1.442695, %v1389_v39 }
 0x440   : > { %v1372_v9 = vpop.xlane.xlu0 %1371 }
 0x441   : > { %4034 = vpow2.f32 %v1398_v31  ;;  %v1390_v6 = vsub.f32 %v1357_v26, %v1372_v9 }
 0x443   : > { %v4888_v16 = vpop.eup %4032  ;;  %v1400_v17 = vmul.f32 1.442695, %v1390_v6 }
 0x444   : > { %v1375_v7 = vpop.xlane.xlu0 %1374  ;;  %v1412_v8 = vsel %vm1363_vm4, %v4888_v16, 0.0 }
 0x445   : > { %4036 = vpow2.f32 %v1400_v17  ;;  %v1391_v20 = vsub.f32 %v1358_v44, %v1375_v7  ;;  %1413 = vadd.xlane.f32.xlu0 %v1412_v8 }
 0x447   : > { %v1402_v11 = vmul.f32 1.442695, %v1391_v20 }
 0x448   : > { %v1378_v21 = vpop.xlane.xlu0 %1377 }
 0x449   : > { %4038 = vpow2.f32 %v1402_v11  ;;  %v1392_v23 = vsub.f32 %v1359_v0, %v1378_v21 }
 0x44b   : > { %v4892_v24 = vpop.eup %4034  ;;  %v1404_v27 = vmul.f32 1.442695, %v1392_v23 }
 0x44c   : > { %v1415_v26 = vsel %vm1363_vm4, %v4892_v24, 0.0  ;;  %v1381_v63 = vpop.xlane.xlu1 %1380 }
 0x44d   : > { %4040 = vpow2.f32 %v1404_v27  ;;  %1416 = vadd.xlane.f32.xlu1 %v1415_v26  ;;  %v1393_v3 = vsub.f32 %v4860_v25, %v1381_v63 }
 0x44f   : > { %v4896_v28 = vpop.eup %4036  ;;  %v1406_v39 = vmul.f32 1.442695, %v1393_v3 }
 0x450   : > { %v1418_v30 = vsel %vm1363_vm4, %v4896_v28, 0.0  ;;  %v1384_v4 = vpop.xlane.xlu0 %1383  ;;  %v4932_v25 = vpop.permute.xlu1 %1707 }
 0x451   : > { %1419 = vadd.xlane.f32.xlu0 %v1418_v30  ;;  %v1394_v31 = vsub.f32 %v4864_v19, %v1384_v4  ;;  %4042 = vpow2.f32 %v1406_v39 }
 0x453   : > { %v4900_v44 = vpop.eup %4038  ;;  %v1408_v48 = vmul.f32 1.442695, %v1394_v31 }
 0x454   : > { %v1421_v32 = vsel %vm1363_vm4, %v4900_v44, 0.0 }
 0x455   : > { %1422 = vadd.xlane.f32.xlu1 %v1421_v32  ;;  %4044 = vpow2.f32 %v1408_v48 }
 0x457   : > { %v4904_v0 = vpop.eup %4040 }
 0x458   : > { %v1424_v38 = vsel %vm1363_vm4, %v4904_v0, 0.0 }
 0x459   : > { %1425 = vadd.xlane.f32.xlu0 %v1424_v38 }
 0x45b   : > { %v4922_v9 = vpop.eup %4042 }
 0x45c   : > { %v1427_v6 = vsel %vm1363_vm4, %v4922_v9, 0.0 }
 0x45f   : > { %v4926_v45 = vpop.eup %4044 }
 0x460   : > { %v1430_v17 = vsel %vm1363_vm4, %v4926_v45, 0.0 }
 0x466   : > { %1805 = vrot.lane.b32.xlu1 %v4910_v59, %s4307_s30 }
 0x46f   : > { %1756 = vrot.lane.b32.xlu0 %v4916_v42, %s4307_s30  ;;  %s5502_s30 = sld [smem:[#allocation18_spill]] }
 0x481   : > { %v1387_v19 = vpop.xlane.xlu1 %1386 }
 0x482   : > { %v1395_v7 = vsub.f32 %v4880_v58, %v1387_v19 }
 0x484   : > { %v1410_v8 = vmul.f32 1.442695, %v1395_v7 }
 0x486   : > { %4046 = vpow2.f32 %v1410_v8 }
 0x48a   : > { %1428 = vadd.xlane.f32.xlu1 %v1427_v6 }
 0x48e   : > { %1431 = vadd.xlane.f32.xlu0 %v1430_v17 }
 0x49b   : > { %1919 = vrot.lane.b32.xlu1 %v4701_v5, %s4308_s15 }
 0x4a4   : > { %1868 = vrot.lane.b32.xlu0 %v4692_v60, %s4308_s15  ;;  %v4947_v60 = vpop.eup %4046 }
 0x4a5   : > { %v1433_v5 = vsel %vm1363_vm4, %v4947_v60, 0.0 }
 0x4a8   : > { %1866 = vrot.lane.b32.xlu0 %v4775_v62, %s4309_s27 }
 0x4ac   : > { %1970 = vrot.lane.b32.xlu0 %v4707_v14, %s4308_s15  ;;  %v1659_v14 = vpop.permute.xlu0 %1658 }
 0x4ad   : > { %v1664_v21 = vsel %vm1466_vm3, %v1659_v14, 0 }
 0x4b0   : > { %1968 = vrot.lane.b32.xlu0 %v4798_v18, %s4309_s27 }
 0x4b4   : > { %2072 = vrot.lane.b32.xlu0 %v4721_v12, %s4308_s15 }
 0x4b8   : > { %2070 = vrot.lane.b32.xlu0 %v4818_v35, %s4309_s27 }
 0x4bc   : > { %2174 = vrot.lane.b32.xlu0 %v4735_v40, %s4308_s15 }
 0x4bf   : > { %1434 = vadd.xlane.f32.xlu1 %v1433_v5 }
 0x4c0   : > { %2172 = vrot.lane.b32.xlu0 %v4838_v2, %s4309_s27 }
 0x4d0   : > { %1917 = vrot.lane.b32.xlu1 %v4786_v10, %s4309_s27 }
 0x4d2   : > { %v1414_v12 = vpop.xlane.xlu0 %1413 }
 0x4d3   : > { %4048 = vrcp.f32 %v1414_v12 }
 0x4d4   : > { %2021 = vrot.lane.b32.xlu1 %v4709_v15, %s4308_s15  ;;  %v1566_v15 = vsel %vm1466_vm3, %v4884_v61, 0 }
 0x4d8   : > { %2019 = vrot.lane.b32.xlu1 %v4806_v33, %s4309_s27 }
 0x4da   : > { %v1417_v40 = vpop.xlane.xlu1 %1416 }
 0x4db   : > { %4050 = vrcp.f32 %v1417_v40 }
 0x4dc   : > { %2123 = vrot.lane.b32.xlu1 %v4723_v13, %s4308_s15 }
 0x4dd   : > { %v4049_v62 = vpop.eup %4048 }
 0x4de   : > { %v1444_v18 = vmul.f32 %v4049_v62, %v4888_v16  ;;  %v1420_v35 = vpop.xlane.xlu0 %1419  ;;  %v1615_v16 = vsel %vm1466_vm3, %v4886_v22, 0 }
 0x4df   : > { %4052 = vrcp.f32 %v1420_v35 }
 0x4e0   : > { %2121 = vrot.lane.b32.xlu1 %v4826_v56, %s4309_s27  ;;  %v1452_v10 = vpack.c.bf16 %v1444_v18, %v1444_v18 }
 0x4e2   : > { %v1423_v2 = vpop.xlane.xlu1 %1422  ;;  %3717 = vmatmul.mubr.msk.bf16.vlgmr.msra.gmra.mrb[32].mxu0 %vm1363_vm4, %v1452_v10 }
 0x4e3   : > { %4054 = vrcp.f32 %v1423_v2  ;;  %3727 = vmatpush3.bf16.msra.mxu0 %v1566_v15  ;;  %3728 = vmatprep.mubr.msk.bf16.mxu0 %vm4306_vm1, %v4305_v55 }
 0x4e4   : > { %2225 = vrot.lane.b32.xlu1 %v4737_v41, %s4308_s15  ;;  %3738 = vmatprep.subr.bf16.mxu0 %v4305_v55 }
 0x4e5   : > { %v4051_v13 = vpop.eup %4050 }
 0x4e6   : > { %v1445_v33 = vmul.f32 %v4051_v13, %v4892_v24  ;;  %v1426_v56 = vpop.xlane.xlu0 %1425  ;;  %v1713_v24 = vsel %vm1466_vm3, %v4932_v25, 0 }
 0x4e7   : > { %4056 = vrcp.f32 %v1426_v56 }
 0x4e8   : > { %2223 = vrot.lane.b32.xlu1 %v4846_v1, %s4309_s27  ;;  %v1453_v58 = vpack.c.bf16 %v1445_v33, %v1445_v33 }
 0x4e9   : > { %v4053_v61 = vpop.eup %4052 }
 0x4ea   : > { %v1446_v20 = vmul.f32 %v4053_v61, %v4896_v28  ;;  %3723 = vmatmul.mubr.msk.bf16.vlgmr.msra.gmra.mrb[24].mxu1 %vm1363_vm4, %v1453_v58  ;;  %v1757_v26 = vpop.permute.xlu0 %1756 }
 0x4eb   : > { %3733 = vmatpush3.bf16.msra.mxu1 %v1615_v16  ;;  %3734 = vmatprep.mubr.msk.bf16.mxu1 %vm4306_vm1, %v4305_v55  ;;  %v1762_v30 = vsel %vm1466_vm3, %v1757_v26, 0 }
 0x4ec   : > { %v1454_v41 = vpack.c.bf16 %v1446_v20, %v1446_v20  ;;  %3744 = vmatprep.subr.bf16.mxu1 %v4305_v55 }
 0x4ed   : > { %v4055_v11 = vpop.eup %4054 }
 0x4ee   : > { %v1447_v1 = vmul.f32 %v4055_v11, %v4900_v44  ;;  %3729 = vmatmul.mubr.msk.bf16.vlgmr.msra.gmra.mrb[36].mxu0 %vm1363_vm4, %v1454_v41  ;;  %v1806_v44 = vpop.permute.xlu1 %1805 }
 0x4ef   : > { %3739 = vmatpush3.bf16.msra.mxu0 %v1664_v21  ;;  %3740 = vmatprep.mubr.msk.bf16.mxu0 %vm4306_vm1, %v4305_v55  ;;  %v1811_v48 = vsel %vm1466_vm3, %v1806_v44, 0  ;;  %v5059_v21 = vld [vmem:[%s5456_s4] ss:$0 sm:$0xff] }
 0x4f0   : > { %v1455_v22 = vpack.c.bf16 %v1447_v1, %v1447_v1  ;;  %3750 = vmatprep.subr.bf16.mxu0 %v4305_v55  ;;  %v734_v1 = vadd.f32 %v5059_v21, %v4679_v52  ;;  %v745_v26 = vadd.f32 %v4681_v53, %v5059_v21 }
 0x4f1   : > { %v4057_v23 = vpop.eup %4056 }
 0x4f2   : > { %v1448_v27 = vmul.f32 %v4057_v23, %v4904_v0  ;;  %3735 = vmatmul.mubr.msk.bf16.vlgmr.msra.gmra.mrb[28].mxu1 %vm1363_vm4, %v1455_v22  ;;  %v737_v22 = vadd.f32 %v5059_v21, %v4683_v54  ;;  %v3482_v23 = vmul.f32 -1.442695, %v734_v1 }
 0x4f3   : > { %3745 = vmatpush3.bf16.msra.mxu1 %v1713_v24  ;;  %3746 = vmatprep.mubr.msk.bf16.mxu1 %vm4306_vm1, %v4305_v55 }
 0x4f4   : > { %v1456_v28 = vpack.c.bf16 %v1448_v27, %v1448_v27  ;;  %3756 = vmatprep.subr.bf16.mxu1 %v4305_v55  ;;  %v3483_v24 = vmul.f32 -1.442695, %v737_v22  ;;  %v742_v27 = vadd.f32 %v4677_v51, %v5059_v21 }
 0x4f6   : > { %3741 = vmatmul.mubr.msk.bf16.vlgmr.msra.gmra.mrb[40].mxu0 %vm1363_vm4, %v1456_v28  ;;  %v3484_v28 = vmul.f32 -1.442695, %v742_v27 }
 0x4f7   : > { %3751 = vmatpush3.bf16.msra.mxu0 %v1762_v30  ;;  %3752 = vmatprep.mubr.msk.bf16.mxu0 %vm4306_vm1, %v4305_v55  ;;  %v3485_v30 = vmul.f32 -1.442695, %v745_v26 }
 0x4f8   : > { %3762 = vmatprep.subr.bf16.mxu0 %v4305_v55 }
 0x517   : > { %v1429_v32 = vpop.xlane.xlu1 %1428 }
 0x518   : > { %4058 = vrcp.f32 %v1429_v32 }
 0x51b   : > { %v1432_v0 = vpop.xlane.xlu0 %1431  ;;  %v1920_v40 = vpop.permute.xlu1 %1919 }
 0x51c   : > { %4060 = vrcp.f32 %v1432_v0  ;;  %v1925_v33 = vsel %vm965_vm2, %v1920_v40, 0 }
 0x51f   : > { %v1869_v38 = vpop.permute.xlu0 %1868 }
 0x520   : > { %v1874_v19 = vsel %vm965_vm2, %v1869_v38, 0 }
 0x522   : > { %v4059_v63 = vpop.eup %4058 }
 0x523   : > { %v1449_v3 = vmul.f32 %v4059_v63, %v4922_v9  ;;  %v1867_v4 = vpop.permute.xlu0 %1866 }
 0x525   : > { %v1457_v39 = vpack.c.bf16 %v1449_v3, %v1449_v3 }
 0x526   : > { %v4061_v31 = vpop.eup %4060 }
 0x527   : > { %v1450_v6 = vmul.f32 %v4061_v31, %v4926_v45  ;;  %3747 = vmatmul.mubr.msk.bf16.vlgmr.msra.gmra.mrb[32].mxu1 %vm1363_vm4, %v1457_v39  ;;  %v1971_v17 = vpop.permute.xlu0 %1970 }
 0x528   : > { %3757 = vmatpush3.bf16.msra.mxu1 %v1811_v48  ;;  %3758 = vmatprep.mubr.msk.bf16.mxu1 %vm4306_vm1, %v4305_v55  ;;  %v1976_v45 = vsel %vm965_vm2, %v1971_v17, 0 }
 0x529   : > { %v1458_v25 = vpack.c.bf16 %v1450_v6, %v1450_v6  ;;  %3768 = vmatprep.subr.bf16.mxu1 %v4305_v55 }
 0x52b   : > { %3753 = vmatmul.mubr.msk.bf16.vlgmr.msra.gmra.mrb[44].mxu0 %vm1363_vm4, %v1458_v25  ;;  %v1969_v9 = vpop.permute.xlu0 %1968 }
 0x52c   : > { %3763 = vmatpush3.bf16.xpose.msra.mxu0 %v1874_v19  ;;  %3764 = vmatprep.mubr.msk.bf16.mxu0 %vm4306_vm1, %v4305_v55 }
 0x52d   : > { %3774 = vmatprep.subr.bf16.mxu0 %v4305_v55 }
 0x52f   : > { %v2073_v7 = vpop.permute.xlu0 %2072 }
 0x530   : > { %v2078_v5 = vsel %vm965_vm2, %v2073_v7, 0 }
 0x533   : > { %3765 = vmatmul.mubr.msk.bf16.vlgmr.msra.gmra.mrb[48].mxu0 %vm965_vm2, %v1867_v4  ;;  %v2071_v8 = vpop.permute.xlu0 %2070 }
 0x534   : > { %3775 = vmatpush3.bf16.xpose.msra.mxu0 %v1976_v45  ;;  %3776 = vmatprep.mubr.msk.bf16.mxu0 %vm4306_vm1, %v4305_v55 }
 0x535   : > { %3786 = vmatprep.subr.bf16.mxu0 %v4305_v55 }
 0x537   : > { %v2175_v14 = vpop.permute.xlu0 %2174 }
 0x538   : > { %v2180_v12 = vsel %vm965_vm2, %v2175_v14, 0 }
 0x53b   : > { %3777 = vmatmul.mubr.msk.bf16.vlgmr.msra.gmra.mrb[52].mxu0 %vm965_vm2, %v1969_v9  ;;  %v2173_v62 = vpop.permute.xlu0 %2172 }
 0x53c   : > { %3787 = vmatpush3.bf16.xpose.msra.mxu0 %v2078_v5  ;;  %3788 = vmatprep.mubr.msk.bf16.mxu0 %vm4306_vm1, %v4305_v55 }
 0x53d   : > { %3798 = vmatprep.subr.bf16.mxu0 %v4305_v55 }
 0x543   : > { %3789 = vmatmul.mubr.msk.bf16.vlgmr.msra.gmra.mrb[56].mxu0 %vm965_vm2, %v2071_v8 }
 0x544   : > { %3799 = vmatpush3.bf16.xpose.msra.mxu0 %v2180_v12  ;;  %3800 = vmatprep.mubr.msk.bf16.mxu0 %vm4306_vm1, %v4305_v55 }
 0x545   : > { %3810 = vmatprep.subr.bf16.mxu0 %v4305_v55 }
 0x54b   : > { %3801 = vmatmul.mubr.msk.bf16.vlgmr.msra.gmra.mrb[60].mxu0 %vm965_vm2, %v2173_v62 }
 0x54c   : > { %v1435_v18 = vpop.xlane.xlu1 %1434  ;;  %3812 = vmatprep.mubr.msk.bf16.mxu0 %vm4306_vm1, %v4305_v55 }
 0x54d   : > { %4062 = vrcp.f32 %v1435_v18 }
 0x54e   : > { %4064 = vpow2.f32 %v3482_v23 }
 0x54f   : > { %4066 = vpow2.f32 %v3483_v24 }
 0x550   : > { %v1918_v35 = vpop.permute.xlu1 %1917  ;;  %4068 = vpow2.f32 %v3484_v28 }
 0x551   : > { %4070 = vpow2.f32 %v3485_v30 }
 0x554   : > { %v2022_v2 = vpop.permute.xlu1 %2021 }
 0x555   : > { %v2027_v58 = vsel %vm965_vm2, %v2022_v2, 0 }
 0x557   : > { %v4063_v10 = vpop.eup %4062 }
 0x558   : > { %v1451_v15 = vmul.f32 %v4063_v10, %v4947_v60  ;;  %v2020_v56 = vpop.permute.xlu1 %2019  ;;  %v4065_v44 = vpop.eup %4064 }
 0x559   : > { %v4067_v32 = vpop.eup %4066  ;;  %v788_v52 = vadd.f32 1.0, %v4065_v44 }
 0x55a   : > { %v1459_v13 = vpack.c.bf16 %v1451_v15, %v1451_v15  ;;  %v789_v0 = vadd.f32 1.0, %v4067_v32  ;;  %v4069_v54 = vpop.eup %4068 }
 0x55b   : > { %4072 = vrcp.f32 %v788_v52  ;;  %v4071_v38 = vpop.eup %4070  ;;  %v790_v3 = vadd.f32 1.0, %v4069_v54 }
 0x55c   : > { %3759 = vmatmul.mubr.msk.bf16.vlgmr.msra.gmra.mrb[36].mxu1 %vm1363_vm4, %v1459_v13  ;;  %v2124_v61 = vpop.permute.xlu1 %2123  ;;  %4074 = vrcp.f32 %v789_v0  ;;  %v791_v4 = vadd.f32 1.0, %v4071_v38 }
 0x55d   : > { %3769 = vmatpush3.bf16.xpose.msra.mxu1 %v1925_v33  ;;  %3770 = vmatprep.mubr.msk.bf16.mxu1 %vm4306_vm1, %v4305_v55  ;;  %v2129_v16 = vsel %vm965_vm2, %v2124_v61, 0  ;;  %4076 = vrcp.f32 %v790_v3 }
 0x55e   : > { %3780 = vmatprep.subr.bf16.mxu1 %v4305_v55  ;;  %4078 = vrcp.f32 %v791_v4 }
 0x560   : > { %v2122_v60 = vpop.permute.xlu1 %2121 }
 0x564   : > { %3771 = vmatmul.mubr.msk.bf16.vlgmr.msra.gmra.mrb[40].mxu1 %vm965_vm2, %v1918_v35  ;;  %v2226_v20 = vpop.permute.xlu1 %2225 }
 0x565   : > { %3781 = vmatpush3.bf16.xpose.msra.mxu1 %v2027_v58  ;;  %3782 = vmatprep.mubr.msk.bf16.mxu1 %vm4306_vm1, %v4305_v55  ;;  %v2231_v41 = vsel %vm965_vm2, %v2226_v20, 0  ;;  %v5069_v53 = vpop.eup %4072  ;;  %v753_v20 = vadd.f32 %v5059_v21, %v4662_v37 }
 0x566   : > { %3792 = vmatprep.subr.bf16.mxu1 %v4305_v55  ;;  %v5071_v48 = vpop.eup %4074 }
 0x567   : > { %v5081_v12 = vpop.eup %4076 }
 0x568   : > { %v2224_v11 = vpop.permute.xlu1 %2223  ;;  %v5083_v62 = vpop.eup %4078 }
 0x56c   : > { %3783 = vmatmul.mubr.msk.bf16.vlgmr.msra.gmra.mrb[44].mxu1 %vm965_vm2, %v2020_v56 }
 0x56d   : > { %3793 = vmatpush3.bf16.xpose.msra.mxu1 %v2129_v16  ;;  %3794 = vmatprep.mubr.msk.bf16.mxu1 %vm4306_vm1, %v4305_v55  ;;  %v750_v16 = vadd.f32 %v5059_v21, %v4656_v34 }
 0x56e   : > { %3804 = vmatprep.subr.bf16.mxu1 %v4305_v55 }
 0x574   : > { %3795 = vmatmul.mubr.msk.bf16.vlgmr.msra.gmra.mrb[48].mxu1 %vm965_vm2, %v2122_v60 }
 0x575   : > { %3805 = vmatpush3.bf16.xpose.msra.mxu1 %v2231_v41  ;;  %3806 = vmatprep.mubr.msk.bf16.mxu1 %vm4306_vm1, %v4305_v55  ;;  %v3486_v41 = vmul.f32 -1.442695, %v750_v16 }
 0x576   : > { %3816 = vmatprep.subr.bf16.mxu1 %v4305_v55 }
 0x577   : > { %4080 = vpow2.f32 %v3486_v41 }
 0x57c   : > { %3807 = vmatmul.mubr.msk.bf16.vlgmr.msra.gmra.mrb[52].mxu1 %vm965_vm2, %v2224_v11  ;;  %v3487_v11 = vmul.f32 -1.442695, %v753_v20 }
 0x57d   : > { %3818 = vmatprep.mubr.msk.bf16.mxu1 %vm4306_vm1, %v4305_v55 }
 0x57e   : > { %4082 = vpow2.f32 %v3487_v11 }
 0x581   : > { %v4081_v1 = vpop.eup %4080 }
 0x582   : > { %v792_v23 = vadd.f32 1.0, %v4081_v1 }
 0x584   : > { %4084 = vrcp.f32 %v792_v23 }
 0x588   : > { %v4083_v22 = vpop.eup %4082 }
 0x589   : > { %v793_v24 = vadd.f32 1.0, %v4083_v22 }
 0x58b   : > { %4086 = vrcp.f32 %v793_v24 }
 0x58e   : > { %v5097_v27 = vpop.eup %4084 }
 0x595   : > { %v5099_v26 = vpop.eup %4086 }
 0x5b5   : > { %v1504_v63 = vpop.f32.mrb[32].mxu0 }
 0x5b6   : > { %v3718_v51 = vpop.f32.mrb[33].mxu0  ;;  %v5074_v17 = vmul.f32 %v5069_v53, %v1504_v63 }
 0x5b7   : > { %v1507_v39 = vpop.f32.mrb[34].mxu0 }
 0x5b8   : > { %v3719_v31 = vpop.f32.mrb[35].mxu0 }
 0x5bd   : > { %v1553_v6 = vpop.f32.mrb[24].mxu1 }
 0x5be   : > { %v5077_v25 = vmul.f32 %v5071_v48, %v1553_v6  ;;  %v3724_v19 = vpop.f32.mrb[25].mxu1 }
 0x5bf   : > { %v1556_v9 = vpop.f32.mrb[26].mxu1  ;;  %v758_v19 = vadd.f32 %v4652_v29, %v5059_v21 }
 0x5c0   : > { %v1861_v45 = vpack.c.bf16 %v5077_v25, %v5074_v17  ;;  %v3725_v7 = vpop.f32.mrb[27].mxu1  ;;  %v761_v9 = vadd.f32 %v4658_v36, %v5059_v21  ;;  %v4160_v25 = vld [vmem:[%s4526_s25 + $0x10] sm:$0xff] }
 0x5c1   : > { %v1602_v8 = vpop.f32.mrb[36].mxu0 }
 0x5c2   : > { %v3730_v5 = vpop.f32.mrb[37].mxu0  ;;  %v5086_v35 = vmul.f32 %v5081_v12, %v1602_v8  ;;  %v3488_v8 = vmul.f32 -1.442695, %v758_v19 }
 0x5c3   : > { %v1605_v14 = vpop.f32.mrb[38].mxu0 }
 0x5c4   : > { %v3731_v40 = vpop.f32.mrb[39].mxu0  ;;  %4088 = vpow2.f32 %v3488_v8 }
 0x5c5   : > { %v1651_v18 = vpop.f32.mrb[28].mxu1  ;;  %v3489_v40 = vmul.f32 -1.442695, %v761_v9 }
 0x5c6   : > { %v5089_v10 = vmul.f32 %v5083_v62, %v1651_v18  ;;  %v3736_v15 = vpop.f32.mrb[29].mxu1 }
 0x5c7   : > { %v1654_v2 = vpop.f32.mrb[30].mxu1  ;;  %4090 = vpow2.f32 %v3489_v40 }
 0x5c8   : > { %v1862_v13 = vpack.c.bf16 %v5089_v10, %v5086_v35  ;;  %v3737_v33 = vpop.f32.mrb[31].mxu1 }
 0x5c9   : > { %v1700_v56 = vpop.f32.mrb[40].mxu0 }
 0x5ca   : > { %v3742_v58 = vpop.f32.mrb[41].mxu0  ;;  %v5102_v34 = vmul.f32 %v5097_v27, %v1700_v56 }
 0x5cb   : > { %v1703_v61 = vpop.f32.mrb[42].mxu0 }
 0x5cc   : > { %v3743_v60 = vpop.f32.mrb[43].mxu0 }
 0x5ce   : > { %v4089_v61 = vpop.eup %4088 }
 0x5cf   : > { %v794_v16 = vadd.f32 1.0, %v4089_v61 }
 0x5d1   : > { %v4091_v36 = vpop.eup %4090  ;;  %4092 = vrcp.f32 %v794_v16 }
 0x5d2   : > { %v795_v41 = vadd.f32 1.0, %v4091_v36 }
 0x5d4   : > { %4094 = vrcp.f32 %v795_v41 }
 0x5db   : > { %v5121_v1 = vpop.eup %4092 }
 0x5de   : > { %v5123_v22 = vpop.eup %4094 }
 0x5fa   : > { %v1749_v28 = vpop.f32.mrb[32].mxu1 }
 0x5fb   : > { %v5105_v37 = vmul.f32 %v5099_v26, %v1749_v28  ;;  %v3748_v30 = vpop.f32.mrb[33].mxu1 }
 0x5fc   : > { %v1752_v44 = vpop.f32.mrb[34].mxu1 }
 0x5fd   : > { %v1863_v32 = vpack.c.bf16 %v5105_v37, %v5102_v34  ;;  %v3749_v52 = vpop.f32.mrb[35].mxu1 }
 0x5fe   : > { %v1798_v0 = vpop.f32.mrb[44].mxu0 }
 0x5ff   : > { %v3754_v54 = vpop.f32.mrb[45].mxu0  ;;  %v5126_v24 = vmul.f32 %v5121_v1, %v1798_v0 }
 0x600   : > { %v1801_v38 = vpop.f32.mrb[46].mxu0 }
 0x601   : > { %v3755_v63 = vpop.f32.mrb[47].mxu0 }
 0x606   : > { %v1910_v3 = vpop.f32.mrb[48].mxu0 }
 0x607   : > { %v5109_v51 = vmul.f32 0.25, %v1910_v3  ;;  %v3766_v4 = vpop.f32.mrb[49].mxu0 }
 0x608   : > { %v1913_v39 = vpop.f32.mrb[50].mxu0 }
 0x609   : > { %v3767_v31 = vpop.f32.mrb[51].mxu0  ;;  %v2281_v6 = vsel %vm1363_vm4, %v5109_v51, -inf }
 0x60a   : > { %2282 = vmax.xlane.f32.xlu0 %v2281_v6 }
 0x60e   : > { %v2012_v7 = vpop.f32.mrb[52].mxu0 }
 0x60f   : > { %v5117_v5 = vmul.f32 0.25, %v2012_v7  ;;  %v3778_v14 = vpop.f32.mrb[53].mxu0 }
 0x610   : > { %v2015_v18 = vpop.f32.mrb[54].mxu0 }
 0x611   : > { %v3779_v15 = vpop.f32.mrb[55].mxu0  ;;  %v2287_v2 = vsel %vm1363_vm4, %v5117_v5, -inf }
 0x612   : > { %2288 = vmax.xlane.f32.xlu0 %v2287_v2 }
 0x616   : > { %v2114_v33 = vpop.f32.mrb[56].mxu0 }
 0x617   : > { %v3790_v56 = vpop.f32.mrb[57].mxu0  ;;  %v2277_v7 = vmul.f32 0.25, %v2114_v33 }
 0x618   : > { %v2117_v29 = vpop.f32.mrb[58].mxu0 }
 0x619   : > { %v3791_v58 = vpop.f32.mrb[59].mxu0  ;;  %v2293_v18 = vsel %vm1363_vm4, %v2277_v7, -inf }
 0x61e   : > { %v2216_v21 = vpop.f32.mrb[60].mxu0 }
 0x61f   : > { %v3802_v60 = vpop.f32.mrb[61].mxu0  ;;  %v2279_v40 = vmul.f32 0.25, %v2216_v21 }
 0x620   : > { %v2219_v20 = vpop.f32.mrb[62].mxu0 }
 0x621   : > { %v3803_v11 = vpop.f32.mrb[63].mxu0  ;;  %v2299_v33 = vsel %vm1363_vm4, %v2279_v40, -inf }
 0x62f   : > { %v1847_v23 = vpop.f32.mrb[36].mxu1 }
 0x630   : > { %v5129_v28 = vmul.f32 %v5123_v22, %v1847_v23  ;;  %v3760_v30 = vpop.f32.mrb[37].mxu1 }
 0x631   : > { %v1850_v44 = vpop.f32.mrb[38].mxu1 }
 0x632   : > { %v1864_v52 = vpack.c.bf16 %v5129_v28, %v5126_v24  ;;  %v3761_v54 = vpop.f32.mrb[39].mxu1 }
 0x637   : > { %v1961_v38 = vpop.f32.mrb[40].mxu1 }
 0x638   : > { %v2274_v63 = vmul.f32 0.25, %v1961_v38  ;;  %v3772_v3 = vpop.f32.mrb[41].mxu1 }
 0x639   : > { %v1964_v4 = vpop.f32.mrb[42].mxu1 }
 0x63a   : > { %v3773_v39 = vpop.f32.mrb[43].mxu1  ;;  %v2284_v31 = vsel %vm1363_vm4, %v2274_v63, -inf }
 0x63b   : > { %2285 = vmax.xlane.f32.xlu1 %v2284_v31 }
 0x63f   : > { %v2063_v6 = vpop.f32.mrb[44].mxu1 }
 0x640   : > { %v5134_v0 = vmul.f32 0.25, %v2063_v6  ;;  %v3784_v19 = vpop.f32.mrb[45].mxu1 }
 0x641   : > { %v2066_v9 = vpop.f32.mrb[46].mxu1 }
 0x642   : > { %v3785_v8 = vpop.f32.mrb[47].mxu1  ;;  %v2290_v14 = vsel %vm1363_vm4, %v5134_v0, -inf }
 0x643   : > { %2291 = vmax.xlane.f32.xlu0 %v2290_v14 }
 0x647   : > { %v2165_v15 = vpop.f32.mrb[48].mxu1  ;;  %2294 = vmax.xlane.f32.xlu0 %v2293_v18 }
 0x648   : > { %v5139_v2 = vmul.f32 0.25, %v2165_v15  ;;  %v3796_v56 = vpop.f32.mrb[49].mxu1 }
 0x649   : > { %v2168_v29 = vpop.f32.mrb[50].mxu1 }
 0x64a   : > { %v3797_v58 = vpop.f32.mrb[51].mxu1  ;;  %v2296_v61 = vsel %vm1363_vm4, %v5139_v2, -inf }
 0x64b   : > { %2297 = vmax.xlane.f32.xlu1 %v2296_v61  ;;  %2300 = vmax.xlane.f32.xlu0 %v2299_v33 }
 0x64f   : > { %v2267_v36 = vpop.f32.mrb[52].mxu1 }
 0x650   : > { %v3808_v60 = vpop.f32.mrb[53].mxu1  ;;  %v5150_v20 = vmul.f32 0.25, %v2267_v36 }
 0x651   : > { %v2270_v16 = vpop.f32.mrb[54].mxu1 }
 0x652   : > { %v3809_v21 = vpop.f32.mrb[55].mxu1  ;;  %v2302_v41 = vsel %vm1363_vm4, %v5150_v20, -inf }
 0x65c   : > { %2425 = vrot.lane.b32.xlu1 %v4749_v46, %s4310_s18 }
 0x660   : > { %2473 = vrot.lane.b32.xlu1 %v4761_v49, %s4310_s18 }
 0x661   : > { %2377 = vrot.lane.b32.xlu0 %v4753_v47, %s4310_s18 }
 0x684   : > { %2303 = vmax.xlane.f32.xlu1 %v2302_v41 }
 0x695   : > { %2521 = vrot.lane.b32.xlu1 %v4767_v50, %s4310_s18 }
 0x697   : > { %v2283_v11 = vpop.xlane.xlu0 %2282 }
 0x698   : > { %v2305_v23 = vsub.f32 %v5109_v51, %v2283_v11 }
 0x69a   : > { %v2313_v30 = vmul.f32 1.442695, %v2305_v23 }
 0x69c   : > { %4096 = vpow2.f32 %v2313_v30 }
 0x69f   : > { %v2289_v46 = vpop.xlane.xlu0 %2288 }
 0x6a0   : > { %v2307_v49 = vsub.f32 %v5117_v5, %v2289_v46 }
 0x6a2   : > { %v2317_v44 = vmul.f32 1.442695, %v2307_v49 }
 0x6a4   : > { %4098 = vpow2.f32 %v2317_v44 }
 0x6a6   : > { %v5158_v47 = vpop.eup %4096 }
 0x6a7   : > { %v2329_v54 = vsel %vm1363_vm4, %v5158_v47, 0.0 }
 0x6a8   : > { %2330 = vadd.xlane.f32.xlu0 %v2329_v54 }
 0x6ae   : > { %v5162_v38 = vpop.eup %4098 }
 0x6af   : > { %v2335_v50 = vsel %vm1363_vm4, %v5162_v38, 0.0 }
 0x6b0   : > { %2336 = vadd.xlane.f32.xlu0 %v2335_v50 }
 0x6c6   : > { %2569 = vrot.lane.b32.xlu0 %v4876_v57, %s4310_s18 }
 0x6c8   : > { %v2286_v51 = vpop.xlane.xlu1 %2285 }
 0x6c9   : > { %v2306_v3 = vsub.f32 %v2274_v63, %v2286_v51 }
 0x6cb   : > { %v2315_v5 = vmul.f32 1.442695, %v2306_v3 }
 0x6cd   : > { %4100 = vpow2.f32 %v2315_v5 }
 0x6d0   : > { %v2292_v4 = vpop.xlane.xlu0 %2291 }
 0x6d1   : > { %v2308_v33 = vsub.f32 %v5134_v0, %v2292_v4 }
 0x6d3   : > { %v2319_v36 = vmul.f32 1.442695, %v2308_v33 }
 0x6d4   : > { %v2295_v39 = vpop.xlane.xlu0 %2294 }
 0x6d5   : > { %v2309_v31 = vsub.f32 %v2277_v7, %v2295_v39 }
 0x6d7   : > { %v5168_v6 = vpop.eup %4100  ;;  %v2321_v19 = vmul.f32 1.442695, %v2309_v31 }
 0x6d8   : > { %v2298_v9 = vpop.xlane.xlu1 %2297  ;;  %v2301_v8 = vpop.xlane.xlu0 %2300  ;;  %v2332_v14 = vsel %vm1363_vm4, %v5168_v6, 0.0 }
 0x6d9   : > { %4102 = vpow2.f32 %v2321_v19  ;;  %v2311_v18 = vsub.f32 %v2279_v40, %v2301_v8  ;;  %2333 = vadd.xlane.f32.xlu1 %v2332_v14  ;;  %v2310_v60 = vsub.f32 %v5139_v2, %v2298_v9 }
 0x6db   : > { %v2325_v15 = vmul.f32 1.442695, %v2311_v18  ;;  %v2323_v16 = vmul.f32 1.442695, %v2310_v60 }
 0x6dc   : > { %v2426_v57 = vpop.permute.xlu1 %2425  ;;  %v2378_v56 = vpop.permute.xlu0 %2377 }
 0x6dd   : > { %v2431_v63 = vsel %vm1466_vm3, %v2426_v57, 0  ;;  %v2383_v29 = vsel %vm1466_vm3, %v2378_v56, 0  ;;  %4104 = vpow2.f32 %v2325_v15 }
 0x6de   : > { %3811 = vmatpush3.bf16.msra.mxu0 %v2383_v29  ;;  %3817 = vmatpush3.bf16.msra.mxu1 %v2431_v63  ;;  %4106 = vpow2.f32 %v2319_v36 }
 0x6df   : > { %3822 = vmatprep.subr.bf16.mxu0 %v4305_v55  ;;  %3828 = vmatprep.subr.bf16.mxu1 %v4305_v55  ;;  %4108 = vpow2.f32 %v2323_v16 }
 0x6e3   : > { %v5176_v7 = vpop.eup %4102 }
 0x6e4   : > { %v2341_v40 = vsel %vm1363_vm4, %v5176_v7, 0.0 }
 0x6e5   : > { %2342 = vadd.xlane.f32.xlu0 %v2341_v40 }
 0x6e7   : > { %v5180_v58 = vpop.eup %4104 }
 0x6e8   : > { %v2347_v61 = vsel %vm1363_vm4, %v5180_v58, 0.0  ;;  %v5194_v21 = vpop.eup %4106 }
 0x6e9   : > { %2348 = vadd.xlane.f32.xlu0 %v2347_v61  ;;  %v2338_v0 = vsel %vm1363_vm4, %v5194_v21, 0.0  ;;  %v5200_v2 = vpop.eup %4108 }
 0x6ea   : > { %2617 = vrot.lane.b32.xlu1 %v4870_v43, %s4310_s18  ;;  %v2474_v43 = vpop.permute.xlu1 %2473 }
 0x6eb   : > { %v2479_v46 = vsel %vm1466_vm3, %v2474_v43, 0 }
 0x6ff   : > { %2665 = vrot.lane.b32.xlu0 %v4916_v42, %s4310_s18 }
 0x703   : > { %2769 = vrot.lane.b32.xlu0 %v5069_v53, %s4309_s27  ;;  %v2344_v53 = vsel %vm1363_vm4, %v5200_v2, 0.0 }
 0x707   : > { %2773 = vrot.lane.b32.xlu0 %v5081_v12, %s4309_s27 }
 0x70b   : > { %2777 = vrot.lane.b32.xlu0 %v5097_v27, %s4309_s27 }
 0x70e   : > { %2339 = vadd.xlane.f32.xlu1 %v2338_v0  ;;  %v4004_v0 = vld [vmem:[%s5457_s5 + $0x8] sm:$0xff]  }
 0x70f   : > { %2781 = vrot.lane.b32.xlu0 %v5121_v1, %s4309_s27 }
 0x711   : > { %v2304_v42 = vpop.xlane.xlu1 %2303 }
 0x712   : > { %v2312_v12 = vsub.f32 %v5150_v20, %v2304_v42  ;;  %2345 = vadd.xlane.f32.xlu1 %v2344_v53 }
 0x714   : > { %v2327_v41 = vmul.f32 1.442695, %v2312_v12 }
 0x716   : > { %4110 = vpow2.f32 %v2327_v41 }
 0x720   : > { %v5207_v27 = vpop.eup %4110 }
 0x721   : > { %v2350_v11 = vsel %vm1363_vm4, %v5207_v27, 0.0 }
 0x722   : > { %2351 = vadd.xlane.f32.xlu1 %v2350_v11 }
 0x733   : > { %2713 = vrot.lane.b32.xlu1 %v4910_v59, %s4310_s18  ;;  %s4232_s18 = scalar_lea.vmem %s4231_s23, 2048 }
 0x735   : > { %v2331_v23 = vpop.xlane.xlu0 %2330 }
 0x736   : > { %4112 = vrcp.f32 %v2331_v23 }
 0x737   : > { %2771 = vrot.lane.b32.xlu1 %v5071_v48, %s4309_s27 }
 0x73b   : > { %2775 = vrot.lane.b32.xlu1 %v5083_v62, %s4309_s27 }
 0x73d   : > { %v2337_v1 = vpop.xlane.xlu0 %2336 }
 0x73e   : > { %4114 = vrcp.f32 %v2337_v1 }
 0x73f   : > { %2779 = vrot.lane.b32.xlu1 %v5099_v26, %s4309_s27 }
 0x740   : > { %v4113_v20 = vpop.eup %4112 }
 0x741   : > { %v2361_v30 = vmul.f32 %v4113_v20, %v5158_v47  ;;  %v2570_v26 = vpop.permute.xlu0 %2569 }
 0x742   : > { %v2575_v44 = vsel %vm1466_vm3, %v2570_v26, 0 }
 0x743   : > { %2783 = vrot.lane.b32.xlu1 %v5123_v22, %s4309_s27  ;;  %v2369_v59 = vpack.c.bf16 %v2361_v30, %v2361_v30  ;;  %v2522_v22 = vpop.permute.xlu1 %2521  ;;  %s4226_s27 = scalar_lea.vmem %s5404_s13, 1024 }
 0x744   : > { %v2527_v3 = vsel %vm1466_vm3, %v2522_v22, 0  ;;  %p4227_p9 = scmp.ne.s32.totalorder %s5404_s13, %s4226_s27  ;;  %p4234_p0 = scmp.lt.s32.totalorder %s4232_s18, %s4226_s27 }
 0x745   : > { %3813 = vmatmul.mubr.msk.bf16.vlgmr.msra.gmra.mrb[64].mxu0 %vm1363_vm4, %v2369_v59 }
 0x746   : > { %3823 = vmatpush3.bf16.msra.mxu0 %v2479_v46  ;;  %3824 = vmatprep.mubr.msk.bf16.mxu0 %vm4306_vm1, %v4305_v55  ;;  %p4228_p2 = pnand %p4227_p9, %p5503_p10  ;;  %p4235_p6 = por %p4234_p0, %p4233_p5 }
 0x747   : > { %3834 = vmatprep.subr.bf16.mxu0 %v4305_v55 }
 0x748   : > { %v4115_v48 = vpop.eup %4114  ;;  %p4229_p4 = pneg %p4228_p2 }
 0x749   : > { %v2363_v62 = vmul.f32 %v4115_v48, %v5162_v38 }
 0x74a   : > { %p4236_p13 = pnand %p4235_p6, %p4229_p4 }
 0x74b   : > { %v2371_v49 = vpack.c.bf16 %v2363_v62, %v2363_v62 }
 0x74d   : > { %3825 = vmatmul.mubr.msk.bf16.vlgmr.msra.gmra.mrb[68].mxu0 %vm1363_vm4, %v2371_v49 }
 0x74e   : > { %3835 = vmatpush3.bf16.msra.mxu0 %v2575_v44  ;;  %3836 = vmatprep.mubr.msk.bf16.mxu0 %vm4306_vm1, %v4305_v55 }
 0x74f   : > { %3846 = vmatprep.subr.bf16.mxu0 %v4305_v55 }
 0x766   : > { %v2334_v47 = vpop.xlane.xlu1 %2333 }
 0x767   : > { %4116 = vrcp.f32 %v2334_v47 }
 0x76a   : > { %v2618_v18 = vpop.permute.xlu1 %2617 }
 0x76b   : > { %v2623_v40 = vsel %vm1466_vm3, %v2618_v18, 0 }
 0x771   : > { %v4117_v54 = vpop.eup %4116 }
 0x772   : > { %v2362_v50 = vmul.f32 %v4117_v54, %v5168_v6  ;;  %v2343_v51 = vpop.xlane.xlu0 %2342 }
 0x773   : > { %4118 = vrcp.f32 %v2343_v51 }
 0x774   : > { %v2370_v38 = vpack.c.bf16 %v2362_v50, %v2362_v50 }
 0x776   : > { %3819 = vmatmul.mubr.msk.bf16.vlgmr.msra.gmra.mrb[56].mxu1 %vm1363_vm4, %v2370_v38  ;;  %v2349_v5 = vpop.xlane.xlu0 %2348 }
 0x777   : > { %3829 = vmatpush3.bf16.msra.mxu1 %v2527_v3  ;;  %3830 = vmatprep.mubr.msk.bf16.mxu1 %vm4306_vm1, %v4305_v55  ;;  %4120 = vrcp.f32 %v2349_v5 }
 0x778   : > { %3840 = vmatprep.subr.bf16.mxu1 %v4305_v55 }
 0x77a   : > { %v2666_v31 = vpop.permute.xlu0 %2665 }
 0x77b   : > { %v2671_v9 = vsel %vm1466_vm3, %v2666_v31, 0 }
 0x77d   : > { %v4119_v4 = vpop.eup %4118 }
 0x77e   : > { %v2365_v39 = vmul.f32 %v4119_v4, %v5176_v7  ;;  %v2770_v1 = vpop.permute.xlu0 %2769 }
 0x780   : > { %v2373_v6 = vpack.c.bf16 %v2365_v39, %v2365_v39 }
 0x781   : > { %v4121_v19 = vpop.eup %4120 }
 0x782   : > { %3837 = vmatmul.mubr.msk.bf16.vlgmr.msra.gmra.mrb[72].mxu0 %vm1363_vm4, %v2373_v6  ;;  %v2367_v8 = vmul.f32 %v4121_v19, %v5180_v58  ;;  %v2774_v5 = vpop.permute.xlu0 %2773 }
 0x783   : > { %3847 = vmatpush3.bf16.msra.mxu0 %v2671_v9  ;;  %3848 = vmatprep.mubr.msk.bf16.mxu0 %vm4306_vm1, %v4305_v55 }
 0x784   : > { %v2375_v14 = vpack.c.bf16 %v2367_v8, %v2367_v8  ;;  %3858 = vmatprep.subr.bf16.mxu0 %v4004_v0 }
 0x786   : > { %v2778_v18 = vpop.permute.xlu0 %2777 }
 0x78a   : > { %3849 = vmatmul.mubr.msk.bf16.vlgmr.msra.gmra.mrb[76].mxu0 %vm1363_vm4, %v2375_v14 }
 0x78b   : > { %3859 = vmatpush3.bf16.msra.mxu0 %v4004_v0 }
 0x79b   : > { %v2340_v15 = vpop.xlane.xlu1 %2339 }
 0x79c   : > { %4122 = vrcp.f32 %v2340_v15 }
 0x79f   : > { %v2346_v57 = vpop.xlane.xlu1 %2345 }
 0x7a0   : > { %4124 = vrcp.f32 %v2346_v57 }
 0x7a6   : > { %v4123_v56 = vpop.eup %4122 }
 0x7a7   : > { %v2364_v63 = vmul.f32 %v4123_v56, %v5194_v21 }
 0x7a9   : > { %v2372_v29 = vpack.c.bf16 %v2364_v63, %v2364_v63 }
 0x7aa   : > { %v4125_v7 = vpop.eup %4124 }
 0x7ab   : > { %3831 = vmatmul.mubr.msk.bf16.vlgmr.msra.gmra.mrb[60].mxu1 %vm1363_vm4, %v2372_v29  ;;  %v2366_v58 = vmul.f32 %v4125_v7, %v5200_v2  ;;  %v4005_v2 = vld [vmem:[%s5457_s5] sm:$0xff]  }
 0x7ac   : > { %3841 = vmatpush3.bf16.msra.mxu1 %v2623_v40  ;;  %3842 = vmatprep.mubr.msk.bf16.mxu1 %vm4306_vm1, %v4305_v55 }
 0x7ad   : > { %3852 = vmatprep.subr.bf16.mxu1 %v4305_v55  ;;  %v2374_v33 = vpack.c.bf16 %v2366_v58, %v2366_v58  ;;  %3868 = vmatprep.subr.bf16.mxu0 %v4005_v2 }
 0x7af   : > { %v2352_v61 = vpop.xlane.xlu1 %2351 }
 0x7b0   : > { %4126 = vrcp.f32 %v2352_v61  ;;  %v2782_v61 = vpop.permute.xlu0 %2781 }
 0x7b3   : > { %3843 = vmatmul.mubr.msk.bf16.vlgmr.msra.gmra.mrb[64].mxu1 %vm1363_vm4, %v2374_v33  ;;  %v2714_v36 = vpop.permute.xlu1 %2713 }
 0x7b4   : > { %v2719_v60 = vsel %vm1466_vm3, %v2714_v36, 0  ;;  %3854 = vmatprep.mubr.msk.bf16.mxu1 %vm4306_vm1, %v4305_v55 }
 0x7b5   : > { %3853 = vmatpush3.bf16.msra.mxu1 %v2719_v60 }
 0x7b7   : > { %v2772_v20 = vpop.permute.xlu1 %2771 }
 0x7ba   : > { %v4127_v16 = vpop.eup %4126 }
 0x7bb   : > { %v2368_v21 = vmul.f32 %v4127_v16, %v5207_v27  ;;  %v2776_v4 = vpop.permute.xlu1 %2775 }
 0x7bd   : > { %v2376_v43 = vpack.c.bf16 %v2368_v21, %v2368_v21 }
 0x7bf   : > { %3855 = vmatmul.mubr.msk.bf16.vlgmr.msra.gmra.mrb[68].mxu1 %vm1363_vm4, %v2376_v43  ;;  %v2780_v15 = vpop.permute.xlu1 %2779 }
 0x7c3   : > { %v2784_v33 = vpop.permute.xlu1 %2783 }
 0x818   : > { %v2419_v42 = vpop.f32.mrb[64].mxu0 }
 0x819   : > { %v3814_v55 = vpop.f32.mrb[65].mxu0  ;;  %v2793_v59 = vmul.f32 %v2770_v1, %v2419_v42 }
 0x81a   : > { %v2422_v53 = vpop.f32.mrb[66].mxu0 }
 0x81b   : > { %v3815_v12 = vpop.f32.mrb[67].mxu0 }
 0x820   : > { %v2515_v41 = vpop.f32.mrb[68].mxu0 }
 0x821   : > { %v3826_v27 = vpop.f32.mrb[69].mxu0  ;;  %v2795_v31 = vmul.f32 %v2774_v5, %v2515_v41 }
 0x822   : > { %v2518_v11 = vpop.f32.mrb[70].mxu0 }
 0x823   : > { %v3827_v23 = vpop.f32.mrb[71].mxu0 }
 0x824   : > { %v4164_v23 = vld [vmem:[%s4526_s25 + $0x20] sm:$0xff] }
 0x849   : > { %v2467_v30 = vpop.f32.mrb[56].mxu1 }
 0x84a   : > { %v2794_v46 = vmul.f32 %v2772_v20, %v2467_v30  ;;  %v3820_v48 = vpop.f32.mrb[57].mxu1 }
 0x84b   : > { %v2470_v62 = vpop.f32.mrb[58].mxu1  ;;  %v4165_v48 = vld [vmem:[%s4526_s25 + $0x38] sm:$0xff] }
 0x84c   : > { %v2801_v26 = vpack.c.bf16 %v2794_v46, %v2793_v59  ;;  %v3821_v49 = vpop.f32.mrb[59].mxu1 }
 0x84e   : > { %3860 = vmatprep.mubr.msk.bf16.mxu0 %vm965_vm2, %v2801_v26  ;;  %v4166_v26 = vld [vmem:[%s4526_s25 + $0x28] sm:$0xff] }
 0x855   : > { %v2611_v44 = vpop.f32.mrb[72].mxu0 }
 0x856   : > { %v3838_v22 = vpop.f32.mrb[73].mxu0  ;;  %v2797_v56 = vmul.f32 %v2778_v18, %v2611_v44  ;;  %v4167_v44 = vld [vmem:[%s4526_s25 + $0x30] sm:$0xff] }
 0x857   : > { %v2614_v47 = vpop.f32.mrb[74].mxu0 }
 0x858   : > { %v3839_v54 = vpop.f32.mrb[75].mxu0 }
 0x85d   : > { %v2707_v50 = vpop.f32.mrb[76].mxu0 }
 0x85e   : > { %v3850_v51 = vpop.f32.mrb[77].mxu0  ;;  %v2799_v60 = vmul.f32 %v2782_v61, %v2707_v50 }
 0x85f   : > { %v2710_v38 = vpop.f32.mrb[78].mxu0 }
 0x860   : > { %v3851_v3 = vpop.f32.mrb[79].mxu0 }
 0x87e   : > { %v2563_v39 = vpop.f32.mrb[60].mxu1 }
 0x87f   : > { %v2796_v6 = vmul.f32 %v2776_v4, %v2563_v39  ;;  %v3832_v19 = vpop.f32.mrb[61].mxu1 }
 0x880   : > { %v2566_v9 = vpop.f32.mrb[62].mxu1  ;;  %v4008_v19 = vld [vmem:[%s5463_s11] sm:$0xff]  }
 0x881   : > { %v2802_v8 = vpack.c.bf16 %v2796_v6, %v2795_v31  ;;  %v3833_v14 = vpop.f32.mrb[63].mxu1  ;;  %v4006_v31 = vld [vmem:[%s5461_s9] sm:$0xff]   ;;  %v4007_v6 = vld [vmem:[%s5461_s9 + $0x8] sm:$0xff]  }
 0x882   : > { %3878 = vmatprep.subr.bf16.mxu1 %v4006_v31 }
 0x883   : > { %3861 = vmatmul.mubr.msk.bf16.vlgmr.msra.gmra.mrb[80].mxu0 %vm965_vm2, %v2802_v8  ;;  %3879 = vmatpush3.bf16.msra.mxu1 %v4006_v31 }
 0x884   : > { %3869 = vmatpush3.bf16.msra.mxu0 %v4005_v2  ;;  %3880 = vmatprep.subr.bf16.mxu1 %v4007_v6 }
 0x886   : > { %v2659_v57 = vpop.f32.mrb[64].mxu1 }
 0x887   : > { %v2798_v63 = vmul.f32 %v2780_v15, %v2659_v57  ;;  %v3844_v29 = vpop.f32.mrb[65].mxu1  ;;  %3881 = vmatpush3.bf16.msra.mxu1 %v4007_v6  ;;  %v4010_v6 = vld [vmem:[%s5463_s11 + $0x10] sm:$0xff]  }
 0x888   : > { %v2662_v7 = vpop.f32.mrb[66].mxu1  ;;  %3890 = vmatprep.subr.bf16.mxu1 %v4008_v19 }
 0x889   : > { %v2803_v40 = vpack.c.bf16 %v2798_v63, %v2797_v56  ;;  %v3845_v58 = vpop.f32.mrb[67].mxu1 }
 0x88b   : > { %3864 = vmatprep.mubr.msk.bf16.mxu0 %vm965_vm2, %v2803_v40 }
 0x892   : > { %v2755_v36 = vpop.f32.mrb[68].mxu1 }
 0x893   : > { %v2800_v16 = vmul.f32 %v2784_v33, %v2755_v36  ;;  %v3856_v21 = vpop.f32.mrb[69].mxu1 }
 0x894   : > { %v2758_v43 = vpop.f32.mrb[70].mxu1 }
 0x895   : > { %v2804_v0 = vpack.c.bf16 %v2800_v16, %v2799_v60  ;;  %v3857_v2 = vpop.f32.mrb[71].mxu1 }
 0x897   : > { %3865 = vmatmul.mubr.msk.bf16.gmra.mrb[84].mxu0 %vm965_vm2, %v2804_v0 }
 0x898   : > { %3870 = vmatprep.mubr.msk.bf16.mxu0 %vm965_vm2, %v1861_v45  ;;  %v4161_v45 = vld [vmem:[%s4526_s25] sm:$0xff] }
 0x89f   : > { %3871 = vmatmul.mubr.msk.bf16.vlgmr.msra.gmra.mrb[80].mxu0 %vm965_vm2, %v1862_v13  ;;  %v4162_v13 = vld [vmem:[%s4526_s25 + $0x8] sm:$0xff] }
 0x8a0   : > { %3874 = vmatprep.mubr.msk.bf16.mxu0 %vm965_vm2, %v1863_v32  ;;  %v4163_v32 = vld [vmem:[%s4526_s25 + $0x18] sm:$0xff]  ;;  %s3555_s25 = sshll.u32 %s4405_s29, 10  ;;  %s3359_s29 = scalar_lea.sflag [#allocation4], %s4520_s24 }
 0x8a1   : > { %s5402_s15 = scalar_lea.hbm %s5502_s30, %s3555_s25 }
 0x8a7   : > { %3875 = vmatmul.mubr.msk.bf16.gmra.mrb[84].mxu0 %vm965_vm2, %v1864_v52 }
 0x972   : > { %v3872_v42 = vpop.f32.mrb[80].mxu0 }
 0x973   : > { %v2940_v17 = vpop.f32.mrb[81].mxu0  ;;  %v5286_v55 = vadd.f32 %v4160_v25, %v3872_v42 }
 0x974   : > { %v5289_v53 = vadd.f32 %v4161_v45, %v2940_v17  ;;  %v3873_v35 = vpop.f32.mrb[82].mxu0  ;;  %v3532_v17 = vld [vmem:[%s5460_s8] ss:$0 sm:$0xff] }
 0x975   : > { %v2943_v10 = vpop.f32.mrb[83].mxu0  ;;  %v5297_v24 = vadd.f32 %v4163_v32, %v3873_v35  ;;  %v2982_v12 = vmul.f32 %v5286_v55, %v5286_v55 }
 0x976   : > { %v5292_v34 = vadd.f32 %v4162_v13, %v2943_v10  ;;  %v2980_v37 = vmul.f32 %v5289_v53, %v5289_v53 }
 0x977   : > { %v2994_v30 = vsel %vm492_vm0, %v2982_v12, 0.0  ;;  %v2983_v59 = vmul.f32 %v5297_v24, %v5297_v24 }
 0x978   : > { %v2988_v28 = vsel %vm492_vm0, %v2980_v37, 0.0  ;;  %v2981_v52 = vmul.f32 %v5292_v34, %v5292_v34 }
 0x979   : > { %2989 = vadd.xlane.f32.xlu0 %v2988_v28  ;;  %v2997_v47 = vsel %vm492_vm0, %v2983_v59, 0.0 }
 0x97a   : > { %v3876_v41 = vpop.f32.mrb[84].mxu0  ;;  %v2991_v27 = vsel %vm492_vm0, %v2981_v52, 0.0 }
 0x97b   : > { %2992 = vadd.xlane.f32.xlu1 %v2991_v27  ;;  %v2956_v11 = vpop.f32.mrb[85].mxu0  ;;  %v5318_v22 = vadd.f32 %v4167_v44, %v3876_v41  ;;  %v4009_v44 = vld [vmem:[%s5463_s11 + $0x8] sm:$0xff]  }
 0x97c   : > { %v5306_v1 = vadd.f32 %v4164_v23, %v2956_v11  ;;  %v3877_v20 = vpop.f32.mrb[86].mxu0 }
 0x97d   : > { %2995 = vadd.xlane.f32.xlu0 %v2994_v30  ;;  %v2959_v46 = vpop.f32.mrb[87].mxu0  ;;  %v5312_v62 = vadd.f32 %v4165_v48, %v3877_v20  ;;  %v2986_v5 = vmul.f32 %v5318_v22, %v5318_v22 }
 0x97e   : > { %v5315_v49 = vadd.f32 %v4166_v26, %v2959_v46  ;;  %v2984_v50 = vmul.f32 %v5306_v1, %v5306_v1 }
 0x97f   : > { %v2987_v38 = vmul.f32 %v5312_v62, %v5312_v62  ;;  %v3006_v39 = vsel %vm492_vm0, %v2986_v5, 0.0 }
 0x980   : > { %v2985_v54 = vmul.f32 %v5315_v49, %v5315_v49  ;;  %v3000_v3 = vsel %vm492_vm0, %v2984_v50, 0.0 }
 0x981   : > { %2998 = vadd.xlane.f32.xlu0 %v2997_v47  ;;  %v3009_v4 = vsel %vm492_vm0, %v2987_v38, 0.0 }
 0x982   : > { %v3003_v51 = vsel %vm492_vm0, %v2985_v54, 0.0 }
 0x983   : > { %3004 = vadd.xlane.f32.xlu1 %v3003_v51 }
 0x985   : > { %3001 = vadd.xlane.f32.xlu0 %v3000_v3 }
 0x987   : > { %3010 = vadd.xlane.f32.xlu1 %v3009_v4 }
 0x989   : > { %3007 = vadd.xlane.f32.xlu0 %v3006_v39 }
 0xa06   : > { %v2990_v9 = vpop.xlane.xlu0 %2989 }
 0xa07   : > { %v3012_v8 = vmax.f32 %v2990_v9, 1e-24  ;;  %v4012_v9 = vld [vmem:[%s5463_s11 + $0x20] sm:$0xff]  }
 0xa08   : > { %v2993_v14 = vpop.xlane.xlu1 %2992 }
 0xa09   : > { %4128 = vrsqrt.f32 %v3012_v8  ;;  %v3013_v18 = vmax.f32 %v2993_v14, 1e-24  ;;  %v4013_v8 = vld [vmem:[%s5463_s11 + $0x28] sm:$0xff]   ;;  %v4014_v14 = vld [vmem:[%s5463_s11 + $0x30] sm:$0xff]  }
 0xa0a   : > { %v2996_v15 = vpop.xlane.xlu0 %2995 }
 0xa0b   : > { %4130 = vrsqrt.f32 %v3013_v18  ;;  %v3014_v57 = vmax.f32 %v2996_v15, 1e-24  ;;  %v4015_v18 = vld [vmem:[%s5463_s11 + $0x38] sm:$0xff]   ;;  %v3533_v15 = vld [vmem:[%s5462_s10] ss:$0 sm:$0xff] }
 0xa0d   : > { %4132 = vrsqrt.f32 %v3014_v57 }
 0xa0e   : > { %v2999_v56 = vpop.xlane.xlu0 %2998 }
 0xa0f   : > { %v3015_v63 = vmax.f32 %v2999_v56, 1e-24 }
 0xa10   : > { %v3005_v29 = vpop.xlane.xlu1 %3004 }
 0xa11   : > { %4134 = vrsqrt.f32 %v3015_v63  ;;  %v3017_v7 = vmax.f32 %v3005_v29, 1e-24 }
 0xa12   : > { %v3002_v40 = vpop.xlane.xlu0 %3001 }
 0xa13   : > { %v4129_v58 = vpop.eup %4128  ;;  %4136 = vrsqrt.f32 %v3017_v7  ;;  %v3016_v61 = vmax.f32 %v3002_v40, 1e-24 }
 0xa14   : > { %v3011_v33 = vpop.xlane.xlu1 %3010  ;;  %v3028_v36 = vmul.f32 %v4129_v58, %v5289_v53 }
 0xa15   : > { %v4131_v60 = vpop.eup %4130  ;;  %4138 = vrsqrt.f32 %v3016_v61  ;;  %v3019_v16 = vmax.f32 %v3011_v33, 1e-24 }
 0xa16   : > { %v3008_v21 = vpop.xlane.xlu0 %3007  ;;  %v3029_v43 = vmul.f32 %v4131_v60, %v5292_v34  ;;  %v3036_v0 = vmul.f32 5.656854, %v3028_v36 }
 0xa17   : > { %v4133_v2 = vpop.eup %4132  ;;  %4140 = vrsqrt.f32 %v3019_v16  ;;  %v3018_v42 = vmax.f32 %v3008_v21, 1e-24 }
 0xa18   : > { %v3030_v25 = vmul.f32 %v4133_v2, %v5286_v55  ;;  %v3037_v45 = vmul.f32 5.656854, %v3029_v43  ;;  %v3050_v35 = vmul.f32 %v3532_v17, %v3036_v0 }
 0xa19   : > { %4142 = vrsqrt.f32 %v3018_v42 }
 0xa1a   : > { %v3051_v10 = vmul.f32 %v3532_v17, %v3037_v45  ;;  %v3038_v37 = vmul.f32 5.656854, %v3030_v25 }
 0xa1b   : > { %v4135_v13 = vpop.eup %4134 }
 0xa1c   : > { %v3031_v32 = vmul.f32 %v4135_v13, %v5297_v24  ;;  %v3058_v28 = vpack.c.bf16 %v3051_v10, %v3050_v35  ;;  %v3052_v11 = vmul.f32 %v3532_v17, %v3038_v37 }
 0xa1d   : > { %v4137_v52 = vpop.eup %4136 }
 0xa1e   : > { %v3039_v12 = vmul.f32 5.656854, %v3031_v32  ;;  %3882 = vmatprep.mubr.msk.bf16.mxu1 %vm492_vm0, %v3058_v28  ;;  %v3033_v41 = vmul.f32 %v4137_v52, %v5315_v49 }
 0xa1f   : > { %v4139_v27 = vpop.eup %4138 }
 0xa20   : > { %v3053_v23 = vmul.f32 %v3532_v17, %v3039_v12  ;;  %v3032_v20 = vmul.f32 %v4139_v27, %v5306_v1  ;;  %v3041_v30 = vmul.f32 5.656854, %v3033_v41 }
 0xa21   : > { %v4141_v59 = vpop.eup %4140 }
 0xa22   : > { %v3035_v46 = vmul.f32 %v4141_v59, %v5312_v62  ;;  %v3059_v48 = vpack.c.bf16 %v3053_v23, %v3052_v11  ;;  %v3040_v26 = vmul.f32 5.656854, %v3032_v20  ;;  %v3055_v51 = vmul.f32 %v3532_v17, %v3041_v30 }
 0xa23   : > { %v4143_v47 = vpop.eup %4142 }
 0xa24   : > { %v3034_v54 = vmul.f32 %v4143_v47, %v5318_v22  ;;  %3883 = vmatmul.mubr.msk.bf16.vlgmr.msra.gmra.mrb[72].mxu1 %vm492_vm0, %v3059_v48  ;;  %v3054_v50 = vmul.f32 %v3532_v17, %v3040_v26  ;;  %v3043_v38 = vmul.f32 5.656854, %v3035_v46 }
 0xa25   : > { %3891 = vmatpush3.bf16.msra.mxu1 %v4008_v19  ;;  %v4011_v19 = vld [vmem:[%s5463_s11 + $0x18] sm:$0xff]  }
 0xa26   : > { %v3060_v3 = vpack.c.bf16 %v3055_v51, %v3054_v50  ;;  %v3042_v5 = vmul.f32 5.656854, %v3034_v54  ;;  %3892 = vmatprep.subr.bf16.mxu1 %v4009_v44  ;;  %v3057_v39 = vmul.f32 %v3532_v17, %v3043_v38 }
 0xa28   : > { %3886 = vmatprep.mubr.msk.bf16.mxu1 %vm492_vm0, %v3060_v3  ;;  %v3056_v4 = vmul.f32 %v3532_v17, %v3042_v5 }
 0xa29   : > { %3893 = vmatpush3.bf16.msra.mxu1 %v4009_v44 }
 0xa2a   : > { %v3061_v31 = vpack.c.bf16 %v3057_v39, %v3056_v4  ;;  %3894 = vmatprep.subr.bf16.mxu1 %v4010_v6 }
 0xa2c   : > { %3887 = vmatmul.mubr.msk.bf16.gmra.mrb[76].mxu1 %vm492_vm0, %v3061_v31 }
 0xa2d   : > { %3895 = vmatpush3.bf16.msra.mxu1 %v4010_v6 }
 0xa2e   : > { %3896 = vmatprep.subr.bf16.mxu1 %v4011_v19 }
 0xa31   : > { %3897 = vmatpush3.bf16.msra.mxu1 %v4011_v19 }
 0xa32   : > { %3898 = vmatprep.subr.bf16.mxu1 %v4012_v9 }
 0xa35   : > { %3899 = vmatpush3.bf16.msra.mxu1 %v4012_v9 }
 0xa36   : > { %3900 = vmatprep.subr.bf16.mxu1 %v4013_v8 }
 0xa39   : > { %3901 = vmatpush3.bf16.msra.mxu1 %v4013_v8 }
 0xa3a   : > { %3902 = vmatprep.subr.bf16.mxu1 %v4014_v14 }
 0xa3d   : > { %3903 = vmatpush3.bf16.msra.mxu1 %v4014_v14 }
 0xa3e   : > { %3904 = vmatprep.subr.bf16.mxu1 %v4015_v18 }
 0xa41   : > { %3905 = vmatpush3.bf16.msra.mxu1 %v4015_v18 }
 0xaf7   : > { %v3884_v57 = vpop.f32.mrb[72].mxu1 }
 0xaf8   : > { %v3140_v56 = vadd.f32 %v3884_v57, %v3533_v15  ;;  %v3131_v63 = vpop.f32.mrb[73].mxu1 }
 0xaf9   : > { %v3132_v29 = vadd.f32 %v3533_v15, %v3131_v63  ;;  %v3885_v7 = vpop.f32.mrb[74].mxu1 }
 0xafa   : > { %v3172_v40 = vmul.f32 0.70710677, %v3140_v56  ;;  %v3143_v58 = vadd.f32 %v3885_v7, %v3533_v15  ;;  %v3134_v61 = vpop.f32.mrb[75].mxu1  ;;  %v3164_v11 = vmul.f32 0.5, %v3140_v56  ;;  %v3540_v7 = vld [vmem:[%s5500_s12] ss:$0 sm:$0xff] }
 0xafb   : > { %v3170_v33 = vmul.f32 0.70710677, %v3132_v29  ;;  %v3135_v36 = vadd.f32 %v3533_v15, %v3134_v61  ;;  %v3162_v30 = vmul.f32 0.5, %v3132_v29 }
 0xafc   : > { %4144 = verf.f32 %v3172_v40  ;;  %v3173_v60 = vmul.f32 0.70710677, %v3143_v58  ;;  %v3165_v23 = vmul.f32 0.5, %v3143_v58 }
 0xafd   : > { %4146 = verf.f32 %v3170_v33  ;;  %v3171_v16 = vmul.f32 0.70710677, %v3135_v36  ;;  %v3163_v59 = vmul.f32 0.5, %v3135_v36 }
 0xafe   : > { %4148 = verf.f32 %v3173_v60 }
 0xaff   : > { %4150 = verf.f32 %v3171_v16  ;;  %v3888_v21 = vpop.f32.mrb[76].mxu1 }
 0xb00   : > { %v3156_v43 = vadd.f32 %v3888_v21, %v3533_v15  ;;  %v3147_v0 = vpop.f32.mrb[77].mxu1 }
 0xb01   : > { %v3148_v2 = vadd.f32 %v3533_v15, %v3147_v0  ;;  %v3889_v42 = vpop.f32.mrb[78].mxu1 }
 0xb02   : > { %v3176_v17 = vmul.f32 0.70710677, %v3156_v43  ;;  %v3159_v25 = vadd.f32 %v3889_v42, %v3533_v15  ;;  %v3150_v45 = vpop.f32.mrb[79].mxu1  ;;  %v3168_v31 = vmul.f32 0.5, %v3156_v43 }
 0xb03   : > { %v3174_v35 = vmul.f32 0.70710677, %v3148_v2  ;;  %v3151_v10 = vadd.f32 %v3533_v15, %v3150_v45  ;;  %v3166_v9 = vmul.f32 0.5, %v3148_v2 }
 0xb04   : > { %4152 = verf.f32 %v3176_v17  ;;  %v3177_v13 = vmul.f32 0.70710677, %v3159_v25  ;;  %v3169_v6 = vmul.f32 0.5, %v3159_v25 }
 0xb05   : > { %4154 = verf.f32 %v3174_v35  ;;  %v3175_v37 = vmul.f32 0.70710677, %v3151_v10  ;;  %v3167_v8 = vmul.f32 0.5, %v3151_v10 }
 0xb06   : > { %v4145_v32 = vpop.eup %4144  ;;  %4156 = verf.f32 %v3177_v13 }
 0xb07   : > { %v4147_v28 = vpop.eup %4146  ;;  %v3188_v52 = vadd.f32 1.0, %v4145_v32  ;;  %4158 = verf.f32 %v3175_v37 }
 0xb08   : > { %v4149_v12 = vpop.eup %4148  ;;  %v3186_v41 = vadd.f32 1.0, %v4147_v28 }
 0xb09   : > { %v4151_v27 = vpop.eup %4150  ;;  %v3189_v20 = vadd.f32 1.0, %v4149_v12  ;;  %v3196_v48 = vmul.f32 %v3188_v52, %v3164_v11 }
 0xb0a   : > { %v3187_v46 = vadd.f32 1.0, %v4151_v27  ;;  %v3194_v44 = vmul.f32 %v3186_v41, %v3162_v30 }
 0xb0b   : > { %v3197_v26 = vmul.f32 %v3189_v20, %v3165_v23 }
 0xb0c   : > { %v3195_v47 = vmul.f32 %v3187_v46, %v3163_v59 }
 0xb0d   : > { %v3203_v54 = vpack.c.bf16 %v3197_v26, %v3196_v48 }
 0xb0e   : > { %v4153_v50 = vpop.eup %4152  ;;  %v3202_v51 = vpack.c.bf16 %v3195_v47, %v3194_v44 }
 0xb0f   : > { %v4155_v38 = vpop.eup %4154  ;;  %v3192_v3 = vadd.f32 1.0, %v4153_v50 }
 0xb10   : > { %v4157_v5 = vpop.eup %4156  ;;  %v3190_v4 = vadd.f32 1.0, %v4155_v38  ;;  %3906 = vmatprep.mubr.bf16.mxu1 %v3202_v51 }
 0xb11   : > { %v4159_v39 = vpop.eup %4158  ;;  %v3193_v19 = vadd.f32 1.0, %v4157_v5  ;;  %3907 = vmatmul.mubr.bf16.vlgmr.msra.gmra.mrb[80].mxu1 %v3203_v54  ;;  %v3200_v18 = vmul.f32 %v3192_v3, %v3168_v31 }
 0xb12   : > { %v3191_v14 = vadd.f32 1.0, %v4159_v39  ;;  %v3198_v57 = vmul.f32 %v3190_v4, %v3166_v9 }
 0xb13   : > { %v3201_v15 = vmul.f32 %v3193_v19, %v3169_v6 }
 0xb14   : > { %v3199_v56 = vmul.f32 %v3191_v14, %v3167_v8 }
 0xb15   : > { %v3205_v63 = vpack.c.bf16 %v3201_v15, %v3200_v18 }
 0xb16   : > { %v3204_v29 = vpack.c.bf16 %v3199_v56, %v3198_v57 }
 0xb18   : > { %3910 = vmatprep.mubr.bf16.mxu1 %v3204_v29 }
 0xb19   : > { %3911 = vmatmul.mubr.bf16.gmra.mrb[84].mxu1 %v3205_v63 }
 0xbe4   : > { %v3908_v40 = vpop.f32.mrb[80].mxu1 }
 0xbe5   : > { %v3320_v58 = vadd.f32 %v3908_v40, %v3540_v7  ;;  %v3311_v61 = vpop.f32.mrb[81].mxu1 }
 0xbe6   : > { %v3312_v33 = vadd.f32 %v3540_v7, %v3311_v61  ;;  %v3909_v36 = vpop.f32.mrb[82].mxu1 }
 0xbe7   : > { %v3344_v60 = vadd.f32 %v3320_v58, %v5286_v55  ;;  %v3323_v16 = vadd.f32 %v3909_v36, %v3540_v7  ;;  %v3314_v21 = vpop.f32.mrb[83].mxu1 }
 0xbe8   : > { %v3342_v43 = vadd.f32 %v3312_v33, %v5289_v53  ;;  %v3315_v0 = vadd.f32 %v3540_v7, %v3314_v21 }
 0xbe9   : > { %3352 = vst.msk [vmem:[%s471_s19 + $0x10] sm:$0xff] %vm492_vm0, %v3344_v60  ;;  %v3345_v2 = vadd.f32 %v3323_v16, %v5297_v24 }
 0xbea   : > { %3350 = vst.msk [vmem:[%s471_s19] sm:$0xff] %vm492_vm0, %v3342_v43  ;;  %v3343_v42 = vadd.f32 %v3315_v0, %v5292_v34 }
 0xbeb   : > { %3353 = vst.msk [vmem:[%s471_s19 + $0x18] sm:$0xff] %vm492_vm0, %v3345_v2 }
 0xbec   : > { %3351 = vst.msk [vmem:[%s471_s19 + $0x8] sm:$0xff] %vm492_vm0, %v3343_v42  ;;  %v3912_v55 = vpop.f32.mrb[84].mxu1 }
 0xbed   : > { %v3336_v17 = vadd.f32 %v3912_v55, %v3540_v7  ;;  %v3327_v25 = vpop.f32.mrb[85].mxu1 }
 0xbee   : > { %v3328_v45 = vadd.f32 %v3540_v7, %v3327_v25  ;;  %v3913_v53 = vpop.f32.mrb[86].mxu1 }
 0xbef   : > { %v3348_v35 = vadd.f32 %v3336_v17, %v5318_v22  ;;  %v3339_v24 = vadd.f32 %v3913_v53, %v3540_v7  ;;  %v3330_v10 = vpop.f32.mrb[87].mxu1 }
 0xbf0   : > { %v3346_v13 = vadd.f32 %v3328_v45, %v5306_v1  ;;  %v3331_v34 = vadd.f32 %v3540_v7, %v3330_v10 }
 0xbf1   : > { %3356 = vst.msk [vmem:[%s471_s19 + $0x30] sm:$0xff] %vm492_vm0, %v3348_v35  ;;  %v3349_v37 = vadd.f32 %v3339_v24, %v5312_v62 }
 0xbf2   : > { %3354 = vst.msk [vmem:[%s471_s19 + $0x20] sm:$0xff] %vm492_vm0, %v3346_v13  ;;  %v3347_v22 = vadd.f32 %v3331_v34, %v5315_v49 }
 0xbf3   : > { %3357 = vst.msk [vmem:[%s471_s19 + $0x38] sm:$0xff] %vm492_vm0, %v3349_v37 }
 0xbf4   : > { %3355 = vst.msk [vmem:[%s471_s19 + $0x28] sm:$0xff] %vm492_vm0, %v3347_v22 }
 0xbf5   : > { %4239 = shalt.err (!%p4236_p13)
}
 0xbf6   : > { %s4240_s17 = scalar_lea.hbm %s5402_s15, 1024  ;;  %s4244_s19 = scalar_lea.hbm %s5502_s30, 2048 }
 0xbf7   : > { %p4241_p7 = scmp.ne.s32.totalorder %s5402_s15, %s4240_s17  ;;  %p4245_p1 = scmp.lt.u32.totalorder %s5402_s15, %s5502_s30 }
 0xbf8   : > { %p4246_p11 = scmp.lt.u32.totalorder %s4244_s19, %s4240_s17  ;;  %p4248_p9 = scmp.lt.u32.totalorder %s4240_s17, %s5402_s15 }
 0xbf9   : > { %p4242_p3 = pnand %p4241_p7, %p5503_p10 }
 0xbfa   : > { %p4247_p8 = por %p4246_p11, %p4245_p1 }
 0xbfb   : > { %p4243_p12 = pneg %p4242_p3 }
 0xbfc   : > { %p4249_p2 = por %p4248_p9, %p4247_p8 }
 0xbfe   : > { %p4250_p4 = pnand %p4249_p2, %p4243_p12 }
 0xc00   : > { %4253 = shalt.err (!%p4250_p4)
}
 0xc01   : > { %s4312_s20 = smov 128   ;;  %s4313_s27 = smov 8  }
 0xc02   : > { %3932 = dma.vmem_to_hbm [thread:$0]  (%p5503_p10), %s5404_s13, 1024, %s5402_s15, %s3359_s29, %s4312_s20, %s4312_s20, %s4313_s27  }
 0xc03 PF: > { %s5504_s21 = sld [smem:[#allocation11_spill]]  ;;  %s5505_s23 = sld [smem:[#allocation16_spill]] }
 0xc04   : > { %p5507_p0 = scmp.ge.s32.totalorder %s4296_s28, 2 }
 0xc09   : > { %s3387_s18 = sand.u32 1, %s5504_s21   ;;  %p5506_p5 = scmp.ne.s32.totalorder %s5505_s23, 0 }
 0xc0a   : > { %s3388_s17 = scalar_lea.sflag [#allocation4], %s3387_s18 }
 0xc0b   : > { %p3943_p6 = pnand %p5507_p0, %p5506_p5 }
 0xc0d   : > { %4279 = dma.done.wait (!%p3943_p6), %s3388_s17, 1024  }
 0xc0e   : > { %4281 = vsyncadd (!%p3943_p6), %s3388_s17, 4294966272  ;;  %s5508_s28 = sld [smem:[#allocation13_spill]]  ;;  %s5509_s14 = sld [smem:[#allocation12_spill]] }
 0xc0f   : > { %s5510_s27 = sld [smem:[#allocation14_spill]]  ;;  %s5511_s25 = smov %s4288_s26 }
 0xc14   : > { %p27_p13 = scmp.ge.s32.totalorder %s5508_s28, 4   ;;  %s5512_s26 = smov %s5509_s14 }
 0xc16   :  { %29 = sbr.rel (!%p27_p13) target bundleno = 9 (0x9), region = 121 }
 0xc1d   :  { %3393 = vsyncpa [#allocation3], 1 }
 0xc1e   :  { %3395 = vsyncpa [#allocation3 + $0x1], 1 }
 0xc1f   :  { %3396 = vsyncpa [#allocation6], 1 }
 0xc20   :  { %3397 = vsyncpa [#allocation4], 1 }
 0xc21   :  { %3399 = vsyncpa [#allocation4 + $0x1], 1 }

</bundles_post_ra>
